<compile_context>
chip_gen: v7x
topology: tpu7x:2x2x1
jax: 0.10.0
libtpu: 0.0.40
codegen_flags: <defaults>
</compile_context>

<pallas_src>
import numpy as np
import jax
import jax.numpy as jnp
from jax.experimental import pallas as pl
from jax.experimental.pallas import tpu as pltpu

INF = 10000000000000.0   # same finite "infinity" as the torch code
PAD = 1

EMBEDDING_DIM = 32
VOCAB_LEN = 16


def _elu(x):
    # ELU(alpha=1); exp(min(x,0)) keeps the unselected branch finite.
    return jnp.where(x > 0.0, x, jnp.exp(jnp.minimum(x, 0.0)) - 1.0)


# --------------------------------------------------------------------------
# Fused kernel: DiSAN block on both sentences + final head (one grid step = one
# batch element).
# --------------------------------------------------------------------------
def _disan_kernel(x_ref, m1_ref, m2_ref, wA_ref, wB_ref, fw1_ref, bias_ref,
                  out_ref):
    D = x_ref.shape[-1]
    L1 = m1_ref.shape[1]
    L2 = m2_ref.shape[1]

    # ---- unpack weight / bias slabs (loaded once, stay vreg/VMEM resident) --
    wA = wA_ref[...]                     # (D, 4D) = [Wh | W1 | W2 | Wf2]
    wh_w = wA[:, 0:D]
    w3 = wA[:, D:4 * D]                  # (D, 3D)  [W1 | W2 | Wf2]
    wB = wB_ref[...]                     # (2D, 6D) = [blockdiag(Wf1) | Ws1 | Ws]
    wf1_blk = wB[:, 0:2 * D]
    ws1_w = wB[:, 2 * D:4 * D]
    ws_w = wB[:, 4 * D:6 * D]

    bias = bias_ref[...]                 # (3, 4D)
    wh_b = bias[0:1, 0:D]
    wf2_b = bias[0:1, D:2 * D]
    b_att = bias[0:1, 2 * D:3 * D]
    fb1 = bias[0:1, 3 * D:4 * D]
    ws1_b = bias[1:2, 0:2 * D]
    ws_b = bias[1:2, 2 * D:4 * D]
    fw2_row = bias[2:3, 0:D]             # final (D,1) weight, stored as a row
    fb2 = bias[2:3, D:D + 1]             # (1,1)
    cval = bias[2:3, D + 1:D + 2]        # (1,1) scalar c
    inv_c = 1.0 / cval

    # ---- shared per-token linears over BOTH sentences (stacked rows) --------
    x = x_ref[...].reshape(L1 + L2, D)                              # (L1+L2, D)
    h_all = _elu(jnp.dot(x, wh_w, preferred_element_type=jnp.float32) + wh_b)
    hw_all = jnp.dot(h_all, w3, preferred_element_type=jnp.float32)  # (L1+L2, 3D)

    def branch(h2d, hw, amask, L):
        # h2d: (L, D); hw: (L, 3D) = [W1 h | W2 h | Wf2 h]; amask: (1,L,L,2D) additive
        h1 = hw[:, 0:D].reshape(1, L, D)
        h2 = hw[:, D:2 * D].reshape(1, L, D)
        h_wf2 = hw[:, 2 * D:3 * D] + wf2_b                          # (L, D)

        # att[b,i(query),j(key),e] = c * tanh((h1[i,e] + h2[j,e] + b[e]) / c)
        att = cval * jnp.tanh((h1[:, :, None, :] + h2[:, None, :, :] + b_att) * inv_c)

        # fused fw/bw softmax: stack the two directions on the lane axis (2D=64)
        a = jnp.concatenate([att, att], axis=-1) + amask            # (1,L,L,2D)
        a = a - jnp.max(a, axis=2, keepdims=True)                   # key-axis max
        e = jnp.exp(a)
        p = e * pl.reciprocal(jnp.sum(e, axis=2, keepdims=True), approx=True)

        hk = jnp.concatenate([h2d, h2d], axis=-1)                   # (L, 2D)
        s = jnp.sum(p * hk.reshape(1, 1, L, 2 * D), axis=2)         # (1,L,2D)
        s = s.reshape(L, 2 * D)

        # fused fw/bw gate: block-diag Wf1 so one 64-lane matmul covers both
        f = jax.nn.sigmoid(jnp.dot(s, wf1_blk, preferred_element_type=jnp.float32)
                           + jnp.concatenate([h_wf2, h_wf2], axis=-1))
        u = f * hk + (1.0 - f) * s                                  # (L, 2D) = [u_fw|u_bw]

        att_s = jnp.dot(
            _elu(jnp.dot(u, ws1_w, preferred_element_type=jnp.float32) + ws1_b),
            ws_w, preferred_element_type=jnp.float32) + ws_b
        # source2token pooling: sum over sequence (sublane) axis
        return jnp.sum(u * att_s, axis=0, keepdims=True)            # (1, 2D)

    cvec = branch(h_all[:L1], hw_all[:L1], m1_ref[...], L1)
    rvec = branch(h_all[L1:], hw_all[L1:], m2_ref[...], L2)

    feat = jnp.concatenate([cvec, rvec, cvec - rvec, cvec * rvec], axis=-1)  # (1, 8D)
    hh = jnp.maximum(
        jnp.dot(feat, fw1_ref[...], preferred_element_type=jnp.float32) + fb1, 0.0)
    # final (D,1) layer as an elementwise mul + lane reduce (avoids a 1-lane matmul)
    y = jnp.sum(hh * fw2_row, axis=-1, keepdims=True) + fb2                   # (1,1)
    out_ref[...] = jnp.broadcast_to(y.reshape(1, 1, 1), out_ref.shape)        # lane-dense store


# --------------------------------------------------------------------------
# Host-side additive masks: (B, L, L, 2D) float, 0 where allowed, -INF where
# masked; lanes [0:D] = forward direction, [D:2D] = backward direction.
# --------------------------------------------------------------------------
def _build_additive_mask(x, D):
    B, L = x.shape
    pad = x == PAD
    pad2 = pad[:, :, None] | pad[:, None, :]                        # (B, Lq, Lk)
    tri = jnp.asarray(np.tril(np.ones((L, L), dtype=bool)))         # key j <= query i
    fw = pad2 | tri[None, :, :]
    bw = pad2 | tri.T[None, :, :]
    m = jnp.concatenate([jnp.broadcast_to(fw[..., None], (B, L, L, D)),
                         jnp.broadcast_to(bw[..., None], (B, L, L, D))], axis=-1)
    return (-INF) * m.astype(jnp.float32)


def disan_forward(params, x1, x2):
    D = EMBEDDING_DIM
    blk = params["block"]
    fin = params["final"]
    B, L1 = x1.shape
    _, L2 = x2.shape

    # Embedding gather stays in plain JAX (data-dependent lookup).
    x1e = params["emb"][x1]
    x2e = params["emb"][x2]
    x_all = jnp.concatenate([x1e, x2e], axis=1)                     # (B, L1+L2, D)

    m1 = _build_additive_mask(x1, D)
    m2 = _build_additive_mask(x2, D)

    # ---- host-side weight packing (7 DMAs total into the kernel) -----------
    wf1_blk = jnp.zeros((2 * D, 2 * D), jnp.float32)
    wf1_blk = wf1_blk.at[:D, :D].set(blk["wf1_w"]).at[D:, D:].set(blk["wf1_w"])
    wA = jnp.concatenate([blk["wh_w"], blk["w1_w"], blk["w2_w"], blk["wf2_w"]],
                         axis=1)                                     # (D, 4D) = (32,128)
    wB = jnp.concatenate([wf1_blk, blk["ws1_w"], blk["ws_w"]], axis=1)  # (2D, 6D)
    row0 = jnp.concatenate([blk["wh_b"], blk["wf2_b"], blk["b"], fin["b1"]])
    row1 = jnp.concatenate([blk["ws1_b"], blk["ws_b"]])
    row2 = jnp.concatenate([fin["w2"][:, 0], fin["b2"], blk["c"],
                            jnp.zeros((4 * D - D - 2,), jnp.float32)])
    bias = jnp.stack([row0, row1, row2])                             # (3, 4D)

    out = pl.pallas_call(
        _disan_kernel,
        out_shape=jax.ShapeDtypeStruct((B, 1, 128), jnp.float32),
        grid=(B,),
        in_specs=[
            pl.BlockSpec((1, L1 + L2, D), lambda b: (b, 0, 0)),
            pl.BlockSpec((1, L1, L1, 2 * D), lambda b: (b, 0, 0, 0)),
            pl.BlockSpec((1, L2, L2, 2 * D), lambda b: (b, 0, 0, 0)),
            pl.BlockSpec(wA.shape, lambda b: (0, 0)),
            pl.BlockSpec(wB.shape, lambda b: (0, 0)),
            pl.BlockSpec(fin["w1"].shape, lambda b: (0, 0)),
            pl.BlockSpec(bias.shape, lambda b: (0, 0)),
        ],
        out_specs=pl.BlockSpec((1, 1, 128), lambda b: (b, 0, 0)),
        compiler_params=pltpu.CompilerParams(
            dimension_semantics=("parallel",)),
    )(x_all, m1, m2, wA, wB, fin["w1"], bias)
    return out[:, 0, 0]        # torch .squeeze(-1)


# --------------------------------------------------------------------------
# Deterministic parameter init (shapes from DiSAN / DiSAN_Block.__init__)
# NOTE: embedding is random (PAD row zeroed) so the test exercises real math;
#       the torch spec's _weight buffer happens to be all-zeros.
# --------------------------------------------------------------------------
def init_params(key):
    D = EMBEDDING_DIM
    ks = jax.random.split(key, 18)

    def u(k, shape, fan_in):
        s = 1.0 / np.sqrt(fan_in)
        return jax.random.uniform(k, shape, jnp.float32, -s, s)

    emb = jax.random.normal(ks[0], (VOCAB_LEN, D), jnp.float32) * 0.5
    emb = emb.at[PAD].set(0.0)      # padding_idx row

    block = {
        "wh_w": u(ks[1], (D, D), D), "wh_b": u(ks[2], (D,), D),
        "w1_w": u(ks[3], (D, D), D),
        "w2_w": u(ks[4], (D, D), D),
        "b":    u(ks[5], (D,), D),
        "c":    jnp.array([5.0], jnp.float32),
        "wf1_w": u(ks[6], (D, D), D),
        "wf2_w": u(ks[7], (D, D), D), "wf2_b": u(ks[8], (D,), D),
        "ws1_w": u(ks[9], (2 * D, 2 * D), 2 * D), "ws1_b": u(ks[10], (2 * D,), 2 * D),
        "ws_w":  u(ks[11], (2 * D, 2 * D), 2 * D), "ws_b":  u(ks[12], (2 * D,), 2 * D),
    }
    final = {
        "w1": u(ks[13], (8 * D, D), 8 * D), "b1": u(ks[14], (D,), 8 * D),
        "w2": u(ks[15], (D, 1), D),         "b2": u(ks[16], (1,), D),
    }
    return {"emb": emb, "block": block, "final": final}


# --------------------------------------------------------------------------
# Pure-JAX reference (mirrors the PyTorch forward) for validation
# --------------------------------------------------------------------------
def ref_forward(params, x1, x2):
    blk = params["block"]
    fin = params["final"]

    def block(x, mask):
        xe = params["emb"][x]
        h = jax.nn.elu(xe @ blk["wh_w"] + blk["wh_b"])
        h1 = h @ blk["w1_w"]
        h2 = h @ blk["w2_w"]
        c = blk["c"][0]
        att = c * jnp.tanh((h1[:, :, None, :] + h2[:, None, :, :] + blk["b"]) / c)
        mask2d = (mask[:, :, None] | mask[:, None, :])[..., None]
        att = jnp.where(mask2d, -INF, att)
        L = x.shape[1]
        tri = jnp.tril(jnp.ones((L, L), bool))
        fw = tri[None, :, :, None]
        bw = tri.T[None, :, :, None]

        def mdma(m):
            a = jnp.where(m, -INF, att)
            p = jax.nn.softmax(a, axis=-2)
            s = jnp.einsum('bme,blme->ble', h, p)
            f = jax.nn.sigmoid(s @ blk["wf1_w"] + h @ blk["wf2_w"] + blk["wf2_b"])
            return f * h + (1.0 - f) * s

        u = jnp.concatenate([mdma(fw), mdma(bw)], axis=-1)
        att_s = jax.nn.elu(u @ blk["ws1_w"] + blk["ws1_b"]) @ blk["ws_w"] + blk["ws_b"]
        return jnp.sum(u * att_s, axis=-2)

    c = block(x1, x1 == PAD)
    r = block(x2, x2 == PAD)
    feat = jnp.concatenate([c, r, c - r, c * r], axis=-1)
    hh = jax.nn.relu(feat @ fin["w1"] + fin["b1"])
    return (hh @ fin["w2"] + fin["b2"])[..., 0]


if __name__ == "__main__":
    key = jax.random.PRNGKey(0)
    kp, k1, k2 = jax.random.split(key, 3)
    params = init_params(kp)

    B, M, N = 2, 8, 10
    x1 = jax.random.randint(k1, (B, M), 2, VOCAB_LEN, dtype=jnp.int32)
    x2 = jax.random.randint(k2, (B, N), 2, VOCAB_LEN, dtype=jnp.int32)
    # introduce some padding
    x1 = x1.at[0, 6:].set(PAD)
    x2 = x2.at[1, 7:].set(PAD)

    fwd = jax.jit(disan_forward)
    out = jax.block_until_ready(fwd(params, x1, x2))
    ref = jax.block_until_ready(ref_forward(params, x1, x2))

    assert out.shape == (B,), out.shape
    assert bool(jnp.all(jnp.isfinite(out)))
    np.testing.assert_allclose(np.asarray(out), np.asarray(ref), rtol=2e-2, atol=2e-2)
    print("KERNEL_OK")
</pallas_src>

<mosaic_0001>
module attributes {stable_mosaic.version = 11 : i64} {
  func.func @_disan_kernel(%arg0: i32, %arg1: memref<1x18x32xf32, #tpu.memory_space<vmem>>, %arg2: memref<1x8x8x64xf32, #tpu.memory_space<vmem>>, %arg3: memref<1x10x10x64xf32, #tpu.memory_space<vmem>>, %arg4: memref<32x128xf32, #tpu.memory_space<vmem>>, %arg5: memref<64x192xf32, #tpu.memory_space<vmem>>, %arg6: memref<256x32xf32, #tpu.memory_space<vmem>>, %arg7: memref<3x128xf32, #tpu.memory_space<vmem>>, %arg8: memref<1x1x128xf32, #tpu.memory_space<vmem>>) attributes {dimension_semantics = [#tpu.dimension_semantics<parallel>], iteration_bounds = array<i64: 2>, scalar_prefetch = 0 : i64, scratch_operands = 0 : i64, tpu.core_type = #tpu.core_type<tc>, window_params = [{transform_indices = @transform_0, window_bounds = array<i64: 1, 18, 32>}, {transform_indices = @transform_1, window_bounds = array<i64: 1, 8, 8, 64>}, {transform_indices = @transform_2, window_bounds = array<i64: 1, 10, 10, 64>}, {pipeline_mode = #tpu.pipeline_mode<synchronous>, transform_indices = @transform_3, window_bounds = array<i64: 32, 128>}, {pipeline_mode = #tpu.pipeline_mode<synchronous>, transform_indices = @transform_4, window_bounds = array<i64: 64, 192>}, {pipeline_mode = #tpu.pipeline_mode<synchronous>, transform_indices = @transform_5, window_bounds = array<i64: 256, 32>}, {pipeline_mode = #tpu.pipeline_mode<synchronous>, transform_indices = @transform_6, window_bounds = array<i64: 3, 128>}, {transform_indices = @transform_7, window_bounds = array<i64: 1, 1, 128>}]} {
    %c0 = arith.constant 0 : index
    %c0_0 = arith.constant 0 : index
    %0 = vector.load %arg4[%c0, %c0_0] : memref<32x128xf32, #tpu.memory_space<vmem>>, vector<32x128xf32>
    %1 = vector.extract_strided_slice %0 {offsets = [0, 0], sizes = [32, 32], strides = [1, 1]} : vector<32x128xf32> to vector<32x32xf32>
    %2 = vector.extract_strided_slice %0 {offsets = [0, 32], sizes = [32, 96], strides = [1, 1]} : vector<32x128xf32> to vector<32x96xf32>
    %c0_1 = arith.constant 0 : index
    %c0_2 = arith.constant 0 : index
    %3 = vector.load %arg5[%c0_1, %c0_2] : memref<64x192xf32, #tpu.memory_space<vmem>>, vector<64x192xf32>
    %4 = vector.extract_strided_slice %3 {offsets = [0, 0], sizes = [64, 64], strides = [1, 1]} : vector<64x192xf32> to vector<64x64xf32>
    %5 = vector.extract_strided_slice %3 {offsets = [0, 64], sizes = [64, 64], strides = [1, 1]} : vector<64x192xf32> to vector<64x64xf32>
    %6 = vector.extract_strided_slice %3 {offsets = [0, 128], sizes = [64, 64], strides = [1, 1]} : vector<64x192xf32> to vector<64x64xf32>
    %c0_3 = arith.constant 0 : index
    %c0_4 = arith.constant 0 : index
    %7 = vector.load %arg7[%c0_3, %c0_4] : memref<3x128xf32, #tpu.memory_space<vmem>>, vector<3x128xf32>
    %8 = vector.extract_strided_slice %7 {offsets = [0, 0], sizes = [1, 32], strides = [1, 1]} : vector<3x128xf32> to vector<1x32xf32>
    %9 = vector.extract_strided_slice %7 {offsets = [0, 32], sizes = [1, 32], strides = [1, 1]} : vector<3x128xf32> to vector<1x32xf32>
    %10 = vector.extract_strided_slice %7 {offsets = [0, 64], sizes = [1, 32], strides = [1, 1]} : vector<3x128xf32> to vector<1x32xf32>
    %11 = vector.extract_strided_slice %7 {offsets = [0, 96], sizes = [1, 32], strides = [1, 1]} : vector<3x128xf32> to vector<1x32xf32>
    %12 = vector.extract_strided_slice %7 {offsets = [1, 0], sizes = [1, 64], strides = [1, 1]} : vector<3x128xf32> to vector<1x64xf32>
    %13 = vector.extract_strided_slice %7 {offsets = [1, 64], sizes = [1, 64], strides = [1, 1]} : vector<3x128xf32> to vector<1x64xf32>
    %14 = vector.extract_strided_slice %7 {offsets = [2, 0], sizes = [1, 32], strides = [1, 1]} : vector<3x128xf32> to vector<1x32xf32>
    %15 = vector.extract_strided_slice %7 {offsets = [2, 32], sizes = [1, 1], strides = [1, 1]} : vector<3x128xf32> to vector<1x1xf32>
    %16 = vector.extract_strided_slice %7 {offsets = [2, 33], sizes = [1, 1], strides = [1, 1]} : vector<3x128xf32> to vector<1x1xf32>
    %cst = arith.constant 1.000000e+00 : f32
    %17 = vector.broadcast %cst : f32 to vector<1x1xf32>
    %18 = arith.divf %17, %16 : vector<1x1xf32>
    %c0_5 = arith.constant 0 : index
    %c0_6 = arith.constant 0 : index
    %c0_7 = arith.constant 0 : index
    %19 = vector.load %arg1[%c0_5, %c0_6, %c0_7] : memref<1x18x32xf32, #tpu.memory_space<vmem>>, vector<1x18x32xf32>
    %20 = vector.shape_cast %19 : vector<1x18x32xf32> to vector<18x32xf32>
    %cst_8 = arith.constant dense<0.000000e+00> : vector<18x32xf32>
    %21 = tpu.matmul %20, %1, %cst_8 {dimension_numbers = #tpu.dot_dimension_numbers<[1], [0], [0], [1], [0, 0, 1, 1], [], []>} : vector<18x32xf32>, vector<32x32xf32>, vector<18x32xf32> -> vector<18x32xf32>
    %22 = vector.broadcast %8 : vector<1x32xf32> to vector<18x32xf32>
    %23 = arith.addf %21, %22 : vector<18x32xf32>
    %cst_9 = arith.constant 0.000000e+00 : f32
    %24 = vector.broadcast %cst_9 : f32 to vector<18x32xf32>
    %25 = arith.cmpf ogt, %23, %24 : vector<18x32xf32>
    %cst_10 = arith.constant 0.000000e+00 : f32
    %26 = vector.broadcast %cst_10 : f32 to vector<18x32xf32>
    %27 = arith.minimumf %23, %26 : vector<18x32xf32>
    %28 = math.exp %27 : vector<18x32xf32>
    %cst_11 = arith.constant 1.000000e+00 : f32
    %29 = vector.broadcast %cst_11 : f32 to vector<18x32xf32>
    %30 = arith.subf %28, %29 : vector<18x32xf32>
    %31 = arith.select %25, %23, %30 : vector<18x32xi1>, vector<18x32xf32>
    %cst_12 = arith.constant dense<0.000000e+00> : vector<18x96xf32>
    %32 = tpu.matmul %31, %2, %cst_12 {dimension_numbers = #tpu.dot_dimension_numbers<[1], [0], [0], [1], [0, 0, 1, 1], [], []>} : vector<18x32xf32>, vector<32x96xf32>, vector<18x96xf32> -> vector<18x96xf32>
    %33 = vector.extract_strided_slice %31 {offsets = [0, 0], sizes = [8, 32], strides = [1, 1]} : vector<18x32xf32> to vector<8x32xf32>
    %34 = vector.extract_strided_slice %32 {offsets = [0, 0], sizes = [8, 96], strides = [1, 1]} : vector<18x96xf32> to vector<8x96xf32>
    %c0_13 = arith.constant 0 : index
    %c0_14 = arith.constant 0 : index
    %c0_15 = arith.constant 0 : index
    %c0_16 = arith.constant 0 : index
    %35 = vector.load %arg2[%c0_13, %c0_14, %c0_15, %c0_16] : memref<1x8x8x64xf32, #tpu.memory_space<vmem>>, vector<1x8x8x64xf32>
    %36 = vector.extract_strided_slice %34 {offsets = [0, 0], sizes = [8, 32], strides = [1, 1]} : vector<8x96xf32> to vector<8x32xf32>
    %37 = vector.shape_cast %36 : vector<8x32xf32> to vector<1x8x32xf32>
    %38 = vector.extract_strided_slice %34 {offsets = [0, 32], sizes = [8, 32], strides = [1, 1]} : vector<8x96xf32> to vector<8x32xf32>
    %39 = vector.shape_cast %38 : vector<8x32xf32> to vector<1x8x32xf32>
    %40 = vector.extract_strided_slice %34 {offsets = [0, 64], sizes = [8, 32], strides = [1, 1]} : vector<8x96xf32> to vector<8x32xf32>
    %41 = vector.broadcast %9 : vector<1x32xf32> to vector<8x32xf32>
    %42 = arith.addf %40, %41 : vector<8x32xf32>
    %43 = vector.shape_cast %37 : vector<1x8x32xf32> to vector<1x8x1x32xf32>
    %44 = vector.shape_cast %39 : vector<1x8x32xf32> to vector<1x1x8x32xf32>
    %45 = vector.broadcast %43 : vector<1x8x1x32xf32> to vector<1x8x8x32xf32>
    %46 = vector.broadcast %44 : vector<1x1x8x32xf32> to vector<1x8x8x32xf32>
    %47 = arith.addf %45, %46 : vector<1x8x8x32xf32>
    %48 = vector.shape_cast %10 : vector<1x32xf32> to vector<1x1x1x32xf32>
    %49 = vector.broadcast %48 : vector<1x1x1x32xf32> to vector<1x8x8x32xf32>
    %50 = arith.addf %47, %49 : vector<1x8x8x32xf32>
    %51 = vector.shape_cast %18 : vector<1x1xf32> to vector<1x1x1x1xf32>
    %52 = vector.broadcast %51 : vector<1x1x1x1xf32> to vector<1x8x8x32xf32>
    %53 = arith.mulf %50, %52 : vector<1x8x8x32xf32>
    %54 = math.tanh %53 : vector<1x8x8x32xf32>
    %55 = vector.shape_cast %16 : vector<1x1xf32> to vector<1x1x1x1xf32>
    %56 = vector.broadcast %55 : vector<1x1x1x1xf32> to vector<1x8x8x32xf32>
    %57 = arith.mulf %56, %54 : vector<1x8x8x32xf32>
    %58 = tpu.concatenate %57, %57 in 3 : vector<1x8x8x32xf32>, vector<1x8x8x32xf32> -> vector<1x8x8x64xf32>
    %59 = arith.addf %58, %35 : vector<1x8x8x64xf32>
    %cst_17 = arith.constant dense<0xFF800000> : vector<1x8x64xf32>
    %60 = vector.multi_reduction <maximumf>, %59, %cst_17 [2] : vector<1x8x8x64xf32> to vector<1x8x64xf32>
    %61 = vector.shape_cast %60 : vector<1x8x64xf32> to vector<1x8x1x64xf32>
    %62 = vector.broadcast %61 : vector<1x8x1x64xf32> to vector<1x8x8x64xf32>
    %63 = arith.subf %59, %62 : vector<1x8x8x64xf32>
    %64 = math.exp %63 : vector<1x8x8x64xf32>
    %cst_18 = arith.constant dense<0.000000e+00> : vector<1x8x64xf32>
    %65 = vector.multi_reduction <add>, %64, %cst_18 [2] : vector<1x8x8x64xf32> to vector<1x8x64xf32>
    %66 = vector.shape_cast %65 : vector<1x8x64xf32> to vector<1x8x1x64xf32>
    %67 = tpu.reciprocal %66 {approx = true} : vector<1x8x1x64xf32> -> vector<1x8x1x64xf32>
    %68 = vector.broadcast %67 : vector<1x8x1x64xf32> to vector<1x8x8x64xf32>
    %69 = arith.mulf %64, %68 : vector<1x8x8x64xf32>
    %70 = tpu.concatenate %33, %33 in 1 : vector<8x32xf32>, vector<8x32xf32> -> vector<8x64xf32>
    %71 = vector.shape_cast %70 : vector<8x64xf32> to vector<1x1x8x64xf32>
    %72 = vector.broadcast %71 : vector<1x1x8x64xf32> to vector<1x8x8x64xf32>
    %73 = arith.mulf %69, %72 : vector<1x8x8x64xf32>
    %cst_19 = arith.constant dense<0.000000e+00> : vector<1x8x64xf32>
    %74 = vector.multi_reduction <add>, %73, %cst_19 [2] : vector<1x8x8x64xf32> to vector<1x8x64xf32>
    %75 = vector.shape_cast %74 : vector<1x8x64xf32> to vector<8x64xf32>
    %cst_20 = arith.constant dense<0.000000e+00> : vector<8x64xf32>
    %76 = tpu.matmul %75, %4, %cst_20 {dimension_numbers = #tpu.dot_dimension_numbers<[1], [0], [0], [1], [0, 0, 1, 1], [], []>} : vector<8x64xf32>, vector<64x64xf32>, vector<8x64xf32> -> vector<8x64xf32>
    %77 = tpu.concatenate %42, %42 in 1 : vector<8x32xf32>, vector<8x32xf32> -> vector<8x64xf32>
    %78 = arith.addf %76, %77 : vector<8x64xf32>
    %79 = arith.negf %78 : vector<8x64xf32>
    %80 = math.exp %79 : vector<8x64xf32>
    %cst_21 = arith.constant 1.000000e+00 : f32
    %81 = vector.broadcast %cst_21 : f32 to vector<8x64xf32>
    %82 = arith.addf %81, %80 : vector<8x64xf32>
    %83 = arith.divf %81, %82 : vector<8x64xf32>
    %84 = arith.mulf %83, %70 : vector<8x64xf32>
    %cst_22 = arith.constant 1.000000e+00 : f32
    %85 = vector.broadcast %cst_22 : f32 to vector<8x64xf32>
    %86 = arith.subf %85, %83 : vector<8x64xf32>
    %87 = arith.mulf %86, %75 : vector<8x64xf32>
    %88 = arith.addf %84, %87 : vector<8x64xf32>
    %cst_23 = arith.constant dense<0.000000e+00> : vector<8x64xf32>
    %89 = tpu.matmul %88, %5, %cst_23 {dimension_numbers = #tpu.dot_dimension_numbers<[1], [0], [0], [1], [0, 0, 1, 1], [], []>} : vector<8x64xf32>, vector<64x64xf32>, vector<8x64xf32> -> vector<8x64xf32>
    %90 = vector.broadcast %12 : vector<1x64xf32> to vector<8x64xf32>
    %91 = arith.addf %89, %90 : vector<8x64xf32>
    %cst_24 = arith.constant 0.000000e+00 : f32
    %92 = vector.broadcast %cst_24 : f32 to vector<8x64xf32>
    %93 = arith.cmpf ogt, %91, %92 : vector<8x64xf32>
    %cst_25 = arith.constant 0.000000e+00 : f32
    %94 = vector.broadcast %cst_25 : f32 to vector<8x64xf32>
    %95 = arith.minimumf %91, %94 : vector<8x64xf32>
    %96 = math.exp %95 : vector<8x64xf32>
    %cst_26 = arith.constant 1.000000e+00 : f32
    %97 = vector.broadcast %cst_26 : f32 to vector<8x64xf32>
    %98 = arith.subf %96, %97 : vector<8x64xf32>
    %99 = arith.select %93, %91, %98 : vector<8x64xi1>, vector<8x64xf32>
    %cst_27 = arith.constant dense<0.000000e+00> : vector<8x64xf32>
    %100 = tpu.matmul %99, %6, %cst_27 {dimension_numbers = #tpu.dot_dimension_numbers<[1], [0], [0], [1], [0, 0, 1, 1], [], []>} : vector<8x64xf32>, vector<64x64xf32>, vector<8x64xf32> -> vector<8x64xf32>
    %101 = vector.broadcast %13 : vector<1x64xf32> to vector<8x64xf32>
    %102 = arith.addf %100, %101 : vector<8x64xf32>
    %103 = arith.mulf %88, %102 : vector<8x64xf32>
    %cst_28 = arith.constant dense<0.000000e+00> : vector<64xf32>
    %104 = vector.multi_reduction <add>, %103, %cst_28 [0] : vector<8x64xf32> to vector<64xf32>
    %105 = vector.shape_cast %104 : vector<64xf32> to vector<1x64xf32>
    %106 = vector.extract_strided_slice %31 {offsets = [8, 0], sizes = [10, 32], strides = [1, 1]} : vector<18x32xf32> to vector<10x32xf32>
    %107 = vector.extract_strided_slice %32 {offsets = [8, 0], sizes = [10, 96], strides = [1, 1]} : vector<18x96xf32> to vector<10x96xf32>
    %c0_29 = arith.constant 0 : index
    %c0_30 = arith.constant 0 : index
    %c0_31 = arith.constant 0 : index
    %c0_32 = arith.constant 0 : index
    %108 = vector.load %arg3[%c0_29, %c0_30, %c0_31, %c0_32] : memref<1x10x10x64xf32, #tpu.memory_space<vmem>>, vector<1x10x10x64xf32>
    %109 = vector.extract_strided_slice %107 {offsets = [0, 0], sizes = [10, 32], strides = [1, 1]} : vector<10x96xf32> to vector<10x32xf32>
    %110 = vector.shape_cast %109 : vector<10x32xf32> to vector<1x10x32xf32>
    %111 = vector.extract_strided_slice %107 {offsets = [0, 32], sizes = [10, 32], strides = [1, 1]} : vector<10x96xf32> to vector<10x32xf32>
    %112 = vector.shape_cast %111 : vector<10x32xf32> to vector<1x10x32xf32>
    %113 = vector.extract_strided_slice %107 {offsets = [0, 64], sizes = [10, 32], strides = [1, 1]} : vector<10x96xf32> to vector<10x32xf32>
    %114 = vector.broadcast %9 : vector<1x32xf32> to vector<10x32xf32>
    %115 = arith.addf %113, %114 : vector<10x32xf32>
    %116 = vector.shape_cast %110 : vector<1x10x32xf32> to vector<1x10x1x32xf32>
    %117 = vector.shape_cast %112 : vector<1x10x32xf32> to vector<1x1x10x32xf32>
    %118 = vector.broadcast %116 : vector<1x10x1x32xf32> to vector<1x10x10x32xf32>
    %119 = vector.broadcast %117 : vector<1x1x10x32xf32> to vector<1x10x10x32xf32>
    %120 = arith.addf %118, %119 : vector<1x10x10x32xf32>
    %121 = vector.shape_cast %10 : vector<1x32xf32> to vector<1x1x1x32xf32>
    %122 = vector.broadcast %121 : vector<1x1x1x32xf32> to vector<1x10x10x32xf32>
    %123 = arith.addf %120, %122 : vector<1x10x10x32xf32>
    %124 = vector.shape_cast %18 : vector<1x1xf32> to vector<1x1x1x1xf32>
    %125 = vector.broadcast %124 : vector<1x1x1x1xf32> to vector<1x10x10x32xf32>
    %126 = arith.mulf %123, %125 : vector<1x10x10x32xf32>
    %127 = math.tanh %126 : vector<1x10x10x32xf32>
    %128 = vector.shape_cast %16 : vector<1x1xf32> to vector<1x1x1x1xf32>
    %129 = vector.broadcast %128 : vector<1x1x1x1xf32> to vector<1x10x10x32xf32>
    %130 = arith.mulf %129, %127 : vector<1x10x10x32xf32>
    %131 = tpu.concatenate %130, %130 in 3 : vector<1x10x10x32xf32>, vector<1x10x10x32xf32> -> vector<1x10x10x64xf32>
    %132 = arith.addf %131, %108 : vector<1x10x10x64xf32>
    %cst_33 = arith.constant dense<0xFF800000> : vector<1x10x64xf32>
    %133 = vector.multi_reduction <maximumf>, %132, %cst_33 [2] : vector<1x10x10x64xf32> to vector<1x10x64xf32>
    %134 = vector.shape_cast %133 : vector<1x10x64xf32> to vector<1x10x1x64xf32>
    %135 = vector.broadcast %134 : vector<1x10x1x64xf32> to vector<1x10x10x64xf32>
    %136 = arith.subf %132, %135 : vector<1x10x10x64xf32>
    %137 = math.exp %136 : vector<1x10x10x64xf32>
    %cst_34 = arith.constant dense<0.000000e+00> : vector<1x10x64xf32>
    %138 = vector.multi_reduction <add>, %137, %cst_34 [2] : vector<1x10x10x64xf32> to vector<1x10x64xf32>
    %139 = vector.shape_cast %138 : vector<1x10x64xf32> to vector<1x10x1x64xf32>
    %140 = tpu.reciprocal %139 {approx = true} : vector<1x10x1x64xf32> -> vector<1x10x1x64xf32>
    %141 = vector.broadcast %140 : vector<1x10x1x64xf32> to vector<1x10x10x64xf32>
    %142 = arith.mulf %137, %141 : vector<1x10x10x64xf32>
    %143 = tpu.concatenate %106, %106 in 1 : vector<10x32xf32>, vector<10x32xf32> -> vector<10x64xf32>
    %144 = vector.shape_cast %143 : vector<10x64xf32> to vector<1x1x10x64xf32>
    %145 = vector.broadcast %144 : vector<1x1x10x64xf32> to vector<1x10x10x64xf32>
    %146 = arith.mulf %142, %145 : vector<1x10x10x64xf32>
    %cst_35 = arith.constant dense<0.000000e+00> : vector<1x10x64xf32>
    %147 = vector.multi_reduction <add>, %146, %cst_35 [2] : vector<1x10x10x64xf32> to vector<1x10x64xf32>
    %148 = vector.shape_cast %147 : vector<1x10x64xf32> to vector<10x64xf32>
    %cst_36 = arith.constant dense<0.000000e+00> : vector<10x64xf32>
    %149 = tpu.matmul %148, %4, %cst_36 {dimension_numbers = #tpu.dot_dimension_numbers<[1], [0], [0], [1], [0, 0, 1, 1], [], []>} : vector<10x64xf32>, vector<64x64xf32>, vector<10x64xf32> -> vector<10x64xf32>
    %150 = tpu.concatenate %115, %115 in 1 : vector<10x32xf32>, vector<10x32xf32> -> vector<10x64xf32>
    %151 = arith.addf %149, %150 : vector<10x64xf32>
    %152 = arith.negf %151 : vector<10x64xf32>
    %153 = math.exp %152 : vector<10x64xf32>
    %cst_37 = arith.constant 1.000000e+00 : f32
    %154 = vector.broadcast %cst_37 : f32 to vector<10x64xf32>
    %155 = arith.addf %154, %153 : vector<10x64xf32>
    %156 = arith.divf %154, %155 : vector<10x64xf32>
    %157 = arith.mulf %156, %143 : vector<10x64xf32>
    %cst_38 = arith.constant 1.000000e+00 : f32
    %158 = vector.broadcast %cst_38 : f32 to vector<10x64xf32>
    %159 = arith.subf %158, %156 : vector<10x64xf32>
    %160 = arith.mulf %159, %148 : vector<10x64xf32>
    %161 = arith.addf %157, %160 : vector<10x64xf32>
    %cst_39 = arith.constant dense<0.000000e+00> : vector<10x64xf32>
    %162 = tpu.matmul %161, %5, %cst_39 {dimension_numbers = #tpu.dot_dimension_numbers<[1], [0], [0], [1], [0, 0, 1, 1], [], []>} : vector<10x64xf32>, vector<64x64xf32>, vector<10x64xf32> -> vector<10x64xf32>
    %163 = vector.broadcast %12 : vector<1x64xf32> to vector<10x64xf32>
    %164 = arith.addf %162, %163 : vector<10x64xf32>
    %cst_40 = arith.constant 0.000000e+00 : f32
    %165 = vector.broadcast %cst_40 : f32 to vector<10x64xf32>
    %166 = arith.cmpf ogt, %164, %165 : vector<10x64xf32>
    %cst_41 = arith.constant 0.000000e+00 : f32
    %167 = vector.broadcast %cst_41 : f32 to vector<10x64xf32>
    %168 = arith.minimumf %164, %167 : vector<10x64xf32>
    %169 = math.exp %168 : vector<10x64xf32>
    %cst_42 = arith.constant 1.000000e+00 : f32
    %170 = vector.broadcast %cst_42 : f32 to vector<10x64xf32>
    %171 = arith.subf %169, %170 : vector<10x64xf32>
    %172 = arith.select %166, %164, %171 : vector<10x64xi1>, vector<10x64xf32>
    %cst_43 = arith.constant dense<0.000000e+00> : vector<10x64xf32>
    %173 = tpu.matmul %172, %6, %cst_43 {dimension_numbers = #tpu.dot_dimension_numbers<[1], [0], [0], [1], [0, 0, 1, 1], [], []>} : vector<10x64xf32>, vector<64x64xf32>, vector<10x64xf32> -> vector<10x64xf32>
    %174 = vector.broadcast %13 : vector<1x64xf32> to vector<10x64xf32>
    %175 = arith.addf %173, %174 : vector<10x64xf32>
    %176 = arith.mulf %161, %175 : vector<10x64xf32>
    %cst_44 = arith.constant dense<0.000000e+00> : vector<64xf32>
    %177 = vector.multi_reduction <add>, %176, %cst_44 [0] : vector<10x64xf32> to vector<64xf32>
    %178 = vector.shape_cast %177 : vector<64xf32> to vector<1x64xf32>
    %179 = arith.subf %105, %178 : vector<1x64xf32>
    %180 = arith.mulf %105, %178 : vector<1x64xf32>
    %181 = tpu.concatenate %105, %178, %179, %180 in 1 : vector<1x64xf32>, vector<1x64xf32>, vector<1x64xf32>, vector<1x64xf32> -> vector<1x256xf32>
    %c0_45 = arith.constant 0 : index
    %c0_46 = arith.constant 0 : index
    %182 = vector.load %arg6[%c0_45, %c0_46] : memref<256x32xf32, #tpu.memory_space<vmem>>, vector<256x32xf32>
    %cst_47 = arith.constant dense<0.000000e+00> : vector<1x32xf32>
    %183 = tpu.matmul %181, %182, %cst_47 {dimension_numbers = #tpu.dot_dimension_numbers<[1], [0], [0], [1], [0, 0, 1, 1], [], []>} : vector<1x256xf32>, vector<256x32xf32>, vector<1x32xf32> -> vector<1x32xf32>
    %184 = arith.addf %183, %11 : vector<1x32xf32>
    %cst_48 = arith.constant 0.000000e+00 : f32
    %185 = vector.broadcast %cst_48 : f32 to vector<1x32xf32>
    %186 = arith.maximumf %184, %185 : vector<1x32xf32>
    %187 = arith.mulf %186, %14 : vector<1x32xf32>
    %cst_49 = arith.constant dense<0.000000e+00> : vector<1xf32>
    %188 = vector.multi_reduction <add>, %187, %cst_49 [1] : vector<1x32xf32> to vector<1xf32>
    %189 = vector.shape_cast %188 : vector<1xf32> to vector<1x1xf32>
    %190 = arith.addf %189, %15 : vector<1x1xf32>
    %191 = vector.shape_cast %190 : vector<1x1xf32> to vector<1x1x1xf32>
    %192 = vector.shape_cast %191 : vector<1x1x1xf32> to vector<1x1x1xf32>
    %193 = vector.broadcast %192 : vector<1x1x1xf32> to vector<1x1x128xf32>
    %c0_50 = arith.constant 0 : index
    %c0_51 = arith.constant 0 : index
    %c0_52 = arith.constant 0 : index
    %194 = vector.load %arg8[%c0_50, %c0_51, %c0_52] : memref<1x1x128xf32, #tpu.memory_space<vmem>>, vector<1x1x128xf32>
    tpu.vector_store %arg8[%c0_50, %c0_51, %c0_52], %193 {strides = array<i32>} : memref<1x1x128xf32, #tpu.memory_space<vmem>>, vector<1x1x128xf32>,
    return
  }
  func.func @transform_0(%arg0: i32) -> (i32, i32, i32) {
    %c0_i32 = arith.constant 0 : i32
    %c0_i32_0 = arith.constant 0 : i32
    %c0_i32_1 = arith.constant 0 : i32
    return %arg0, %c0_i32, %c0_i32_0 : i32, i32, i32
  }
  func.func @transform_1(%arg0: i32) -> (i32, i32, i32, i32) {
    %c0_i32 = arith.constant 0 : i32
    %c0_i32_0 = arith.constant 0 : i32
    %c0_i32_1 = arith.constant 0 : i32
    %c0_i32_2 = arith.constant 0 : i32
    return %arg0, %c0_i32, %c0_i32_0, %c0_i32_1 : i32, i32, i32, i32
  }
  func.func @transform_2(%arg0: i32) -> (i32, i32, i32, i32) {
    %c0_i32 = arith.constant 0 : i32
    %c0_i32_0 = arith.constant 0 : i32
    %c0_i32_1 = arith.constant 0 : i32
    %c0_i32_2 = arith.constant 0 : i32
    return %arg0, %c0_i32, %c0_i32_0, %c0_i32_1 : i32, i32, i32, i32
  }
  func.func @transform_3(%arg0: i32) -> (i32, i32) {
    %c0_i32 = arith.constant 0 : i32
    %c0_i32_0 = arith.constant 0 : i32
    %c0_i32_1 = arith.constant 0 : i32
    return %c0_i32, %c0_i32_0 : i32, i32
  }
  func.func @transform_4(%arg0: i32) -> (i32, i32) {
    %c0_i32 = arith.constant 0 : i32
    %c0_i32_0 = arith.constant 0 : i32
    %c0_i32_1 = arith.constant 0 : i32
    return %c0_i32, %c0_i32_0 : i32, i32
  }
  func.func @transform_5(%arg0: i32) -> (i32, i32) {
    %c0_i32 = arith.constant 0 : i32
    %c0_i32_0 = arith.constant 0 : i32
    %c0_i32_1 = arith.constant 0 : i32
    return %c0_i32, %c0_i32_0 : i32, i32
  }
  func.func @transform_6(%arg0: i32) -> (i32, i32) {
    %c0_i32 = arith.constant 0 : i32
    %c0_i32_0 = arith.constant 0 : i32
    %c0_i32_1 = arith.constant 0 : i32
    return %c0_i32, %c0_i32_0 : i32, i32
  }
  func.func @transform_7(%arg0: i32) -> (i32, i32, i32) {
    %c0_i32 = arith.constant 0 : i32
    %c0_i32_0 = arith.constant 0 : i32
    %c0_i32_1 = arith.constant 0 : i32
    return %arg0, %c0_i32, %c0_i32_0 : i32, i32, i32
  }
}

</mosaic_0001>

<bundles_post_ra>
// kernel: disan_forward.1
= control target key start
LH: loop header
LB: loop body
LE: loop exit
PB: predicated region body
PF: predicated region fallthrough
CT: control target
= control target key end

     0   :  { %s3297_s24 = smov 0   ;;  %s4548_s0 = inlined_call_operand.vmem [shape: f32[2,18,32], index: 0, kind: input, shape index: {}]   ;;  %s4549_s1 = inlined_call_operand.vmem [shape: f32[2,8,8,64], index: 1, kind: input, shape index: {}]   ;;  %s4550_s2 = inlined_call_operand.vmem [shape: f32[2,10,10,64], index: 2, kind: input, shape index: {}]   ;;  %s4551_s3 = inlined_call_operand.vmem [shape: f32[32,128], index: 3, kind: input, shape index: {}]   ;;  %s4552_s4 = inlined_call_operand.vmem [shape: f32[64,192], index: 4, kind: input, shape index: {}]   ;;  %s4553_s5 = inlined_call_operand.vmem [shape: f32[256,32], index: 5, kind: input, shape index: {}]   ;;  %s4554_s6 = inlined_call_operand.vmem [shape: f32[3,128], index: 6, kind: input, shape index: {}]   ;;  %s4555_s7 = inlined_call_operand.vmem [shape: f32[2,1,128], index: 7, kind: output, shape index: {}]  }
   0x1 LB: > { %s2588_s25 = sadd.s32 4294967295, %s3246_s24   ;;  %p2592_p0 = scmp.ge.s32.totalorder %s3246_s24, 1  ;;  %s3246_s24 = sphi %s3297_s24, %s17_s24  }
   0x2   : > { %p257_p1 = scmp.lt.s32.totalorder %s3246_s24, 3 }
   0x4   : > { %p258_p2 = pnand %p2592_p0, %p257_p1 }
   0x6   : > { %261 = sbr.rel (%p258_p2) target bundleno = 2406 (0x966), region = 48 }
   0xd   : > { %v315_v0 = vld [vmem:[%s4551_s3] sm:$0xff]  ;;  %v316_v1 = vld [vmem:[%s4551_s3 + $0x8] sm:$0xff]  ;;  %v317_v2 = vld [vmem:[%s4551_s3 + $0x10] sm:$0xff]  ;;  %v4556_v3 = vmov 0.0|0.0   ;;  %vm3249_vm0 = vmmov 0   ;;  %v4558_v6 = vmov 0.0   ;;  %v341_v25 = vlaneseq }
   0xe   : > { %2878 = vmatprep.subr.bf16.mxu0 %v4556_v3  ;;  %v2879_v4 = vpack.c.bf16 %v316_v1, %v315_v0  ;;  %v318_v5 = vld [vmem:[%s4551_s3 + $0x18] sm:$0xff]  ;;  %2738 = vmatprep.mubr.msk.f32.mxu0 %vm3249_vm0, %v4558_v6  ;;  %p297_p3 = scmp.lt.s32.totalorder %s2588_s25, 1  ;;  %v3029_v7 = vpack.i.bf16 %v316_v1, %v315_v0  ;;  %s3251_s11 = smov 96   ;;  %vm345_vm1 = vcmask 261120   ;;  %v335_v17 = vld [vmem:[%s4554_s6] sm:$0x7] }
   0xf   : > { %2884 = vmatprep.subr.bf16.mxu1 %v4556_v3  ;;  %2755 = vmatprep.mubr.msk.f32.mxu1 %vm3249_vm0, %v4558_v6  ;;  %v2882_v8 = vpack.c.bf16 %v318_v5, %v317_v2  ;;  %v3034_v9 = vpack.i.bf16 %v318_v5, %v317_v2  ;;  %3065 = vrcp.f32 %v335_v17  ;;  %s3252_s18 = smov 95   ;;  %v3347_v24 = vrot.slane %v335_v17, 2  ;;  %s3253_s19 = smov 64  }
  0x10   : > { %2880 = vmatpush3.bf16.msra.mxu0 %v2879_v4  ;;  %s4598_s25 = smov (!%p297_p3, %s2588_s25), 1  ;;  %3030 = vrot.lane.b32.xlu0 %v3029_v7, %s3251_s11  ;;  %v3350_v26 = vshrl.u32 %v341_v25, 7  ;;  %v3254_v57 = vmov 1966171168   ;;  %s3255_s22 = smov 32   ;;  %vm769_vm5 = vcmask 523264  }
  0x11   : > { %2881 = vmatprep.subr.bf16.mxu0 %v4556_v3  ;;  %s3006_s12 = smul.u32 24, %s4598_s25  ;;  %4572 = vst [vmem:[#allocation2_spill] sm:$0xff] %v3347_v24  ;;  %v574_v58 = vunpack.c.l.s4 %v3254_v57  ;;  %vm1006_vm6 = vcmask 1041409   ;;  %vm1008_vm7 = vcmask 1042434   ;;  %vm1010_vm8 = vcmask 1043459  }
  0x12   : > { %4573 = vst [vmem:[#allocation3_spill] sm:$0xff] %v3350_v26  ;;  %v3353_v27 = vsub.s32 0, %v3350_v26  ;;  %vm1012_vm9 = vcmask 1044484   ;;  %vm1014_vm10 = vcmask 1045509   ;;  %vm1016_vm11 = vcmask 1046534   ;;  %s3007_s27 = smul.u32 160, %s4598_s25 }
  0x13   : > { %s301_s15 = scalar_lea.vmem %s4548_s0, %s3006_s12  ;;  %v575_v59 = vunpack.c.0.s8 %v574_v58  ;;  %vm1018_vm12 = vcmask 1047559   ;;  %vm1675_vm13 = vcmask 517120   ;;  %s314_s12 = scalar_lea.vmem %s4555_s7, %s4598_s25 }
  0x14   : > { %2883 = vmatpush3.bf16.msra.mxu0 %v2882_v8  ;;  %3035 = vrot.lane.b32.xlu0 %v3034_v9, %s3251_s11  ;;  %v338_v10 = vld [vmem:[%s301_s15] sm:$0xff]  ;;  %v339_v11 = vld [vmem:[%s301_s15 + $0x8] sm:$0xff]  ;;  %v340_v12 = vld [vmem:[%s301_s15 + $0x10] sm:$0x3]  ;;  %v3356_v28 = vrot.slane %v335_v17, %v3353_v27  ;;  %s3982_s30 = scalar_lea.vmem %s4550_s2, %s3007_s27 }
  0x15   : > { %2914 = vmatprep.subr.bf16.mxu0 %v4556_v3  ;;  %v3386_v60 = vsub.s32 %v575_v59, %v3350_v26 }
  0x17   : > { %2739 = vmatmul.mubr.msk.f32.vlgmr.msra.gmra.mrb[0].mxu0 %vm345_vm1, %v338_v10 }
  0x18   : > { %2741 = vmatprep.mubr.msk.f32.mxu0 %vm3249_vm0, %v4558_v6 }
  0x19   : > { %v3066_v22 = vpop.eup %3065 }
  0x1a   : > { %v684_v23 = vrot.slane %v3066_v22, 2 }
  0x1b   : > { %2742 = vmatmul.mubr.msk.f32.gmra.mrb[2].mxu0 %vm345_vm1, %v339_v11 }
  0x1c   : > { %2744 = vmatprep.mubr.msk.f32.mxu0 %vm3249_vm0, %v4558_v6  ;;  %685 = vrot.lane.b32.xlu1 %v684_v23, %s3252_s18 }
  0x1f   : > { %2745 = vmatmul.mubr.msk.f32.gmra.mrb[4].mxu0 %vm345_vm1, %v340_v12 }
  0x20   : > { %2818 = vmatprep.mubr.msk.f32.mxu0 %vm3249_vm0, %v4558_v6  ;;  %708 = vrot.lane.b32.xlu1 %v3347_v24, %s3252_s18 }
  0x24   : > { %672 = vrot.lane.b32.xlu1 %v3356_v28, %s3253_s19 }
  0x82   : > { %v3031_v13 = vpop.permute.xlu0 %3030 }
  0x83   : > { %v3033_v14 = vunpack.i.h.bf16 %v3031_v13  ;;  %v3032_v15 = vunpack.i.l.bf16 %v3031_v13 }
  0x85   : > { %v2885_v16 = vpack.c.bf16 %v3033_v14, %v3032_v15 }
  0x86   : > { %v3036_v18 = vpop.permute.xlu0 %3035 }
  0x87   : > { %v3038_v19 = vunpack.i.h.bf16 %v3036_v18  ;;  %v3037_v20 = vunpack.i.l.bf16 %v3036_v18  ;;  %2886 = vmatpush3.bf16.msra.mxu1 %v2885_v16 }
  0x88   : > { %2887 = vmatprep.subr.bf16.mxu1 %v4556_v3 }
  0x89   : > { %v2888_v21 = vpack.c.bf16 %v3038_v19, %v3037_v20 }
  0x8b   : > { %2889 = vmatpush3.bf16.msra.mxu1 %v2888_v21 }
  0x8c   : > { %2890 = vmatprep.subr.bf16.mxu1 %v4556_v3 }
  0x8e   : > { %v686_v53 = vpop.permute.xlu1 %685 }
  0x8f   : > { %3008 = vpush %v686_v53 }
  0x92   : > { %v709_v54 = vpop.permute.xlu1 %708 }
  0x93   : > { %3010 = vpush %v709_v54 }
  0xc0   : > { %s3009_s20 = spop %3008 }
  0xc4   : > { %s3011_s21 = spop %3010 }
  0xea   : > { %v421_v29 = vpop.f32.mrb[0].mxu0 }
  0xeb   : > { %v422_v30 = vadd.f32 %v421_v29, %v3356_v28  ;;  %v2740_v31 = vpop.f32.mrb[1].mxu0 }
  0xed   : > { %v438_v32 = vmin.f32 %v422_v30, 0.0  ;;  %vm435_vm2 = vcmp.gt.f32.partialorder %v422_v30, 0.0 }
  0xee   : > { %v426_v33 = vpop.f32.mrb[2].mxu0 }
  0xef   : > { %v441_v34 = vmul.f32 1.442695, %v438_v32  ;;  %v427_v35 = vadd.f32 %v426_v33, %v3356_v28  ;;  %v2743_v36 = vpop.f32.mrb[3].mxu0 }
  0xf1   : > { %3067 = vpow2.f32 %v441_v34  ;;  %v439_v37 = vmin.f32 %v427_v35, 0.0  ;;  %vm436_vm3 = vcmp.gt.f32.partialorder %v427_v35, 0.0 }
  0xf2   : > { %v431_v38 = vpop.f32.mrb[4].mxu0 }
  0xf3   : > { %v443_v39 = vmul.f32 1.442695, %v439_v37  ;;  %v432_v40 = vadd.f32 %v431_v38, %v3356_v28  ;;  %v2746_v41 = vpop.f32.mrb[5].mxu0 }
  0xf5   : > { %3069 = vpow2.f32 %v443_v39  ;;  %v440_v42 = vmin.f32 %v432_v40, 0.0  ;;  %vm437_vm4 = vcmp.gt.f32.partialorder %v432_v40, 0.0 }
  0xf7   : > { %v445_v43 = vmul.f32 1.442695, %v440_v42 }
  0xf9   : > { %3071 = vpow2.f32 %v445_v43 }
  0xfb   : > { %v3068_v44 = vpop.eup %3067 }
  0xfc   : > { %v2600_v45 = vadd.f32 -1.0, %v3068_v44 }
  0xfe   : > { %v3361_v46 = vsel %vm435_vm2, %v422_v30, %v2600_v45 }
  0xff   : > { %v3070_v47 = vpop.eup %3069  ;;  %2756 = vmatmul.mubr.msk.f32.vlgmr.msra.gmra.mrb[0].mxu1 %vm345_vm1, %v3361_v46 }
 0x100   : > { %2758 = vmatprep.mubr.msk.f32.mxu1 %vm3249_vm0, %v4558_v6  ;;  %v2601_v48 = vadd.f32 -1.0, %v3070_v47  ;;  %v3438_v47 = vstv %s3009_s20  ;;  %s2623_s20 = sshll.u32 %s4598_s25, 6 }
 0x101   : > { %s3577_s26 = scalar_lea.vmem %s4549_s1, %s2623_s20 }
 0x102   : > { %v3367_v49 = vsel %vm436_vm3, %v427_v35, %v2601_v48 }
 0x103   : > { %v3072_v50 = vpop.eup %3071  ;;  %2759 = vmatmul.mubr.msk.f32.gmra.mrb[2].mxu1 %vm345_vm1, %v3367_v49 }
 0x104   : > { %2761 = vmatprep.mubr.msk.f32.mxu1 %vm3249_vm0, %v4558_v6  ;;  %v2602_v51 = vadd.f32 -1.0, %v3072_v50 }
 0x106   : > { %v3373_v52 = vsel %vm437_vm4, %v432_v40, %v2602_v51  ;;  %v3435_v40 = vpop.permute.xlu1 %672 }
 0x107   : > { %2762 = vmatmul.mubr.msk.f32.gmra.mrb[4].mxu1 %vm345_vm1, %v3373_v52 }
 0x108   : > { %2780 = vmatprep.mubr.msk.f32.mxu1 %vm3249_vm0, %v4558_v6 }
 0x1d2   : > { %v3381_v55 = vpop.f32.mrb[0].mxu1 }
 0x1d3   : > { %661 = vrot.lane.b32.xlu0 %v3381_v55, %s3251_s11  ;;  %v2757_v56 = vpop.f32.mrb[1].mxu1  ;;  %v579_v16 = vrot.slane %v3381_v55, %v3386_v60  ;;  %v572_v17 = vcombine.high %v3381_v55, %v3381_v55 }
 0x1d5   : > { %v587_v18 = vcombine.high %v579_v16, %v579_v16  ;;  %v586_v19 = vrot.slane %v572_v17, %v3386_v60  ;;  %v595_v20 = vrot.slane %v579_v16, %v3386_v60 }
 0x1d6   : > { %v3388_v61 = vpop.f32.mrb[2].mxu1 }
 0x1d7   : > { %v1327_v62 = vcombine.high %v3388_v61, %v3388_v61  ;;  %v1334_v63 = vrot.slane %v3388_v61, %v3386_v60  ;;  %v2760_v0 = vpop.f32.mrb[3].mxu1  ;;  %v609_v21 = vrot.slane %v587_v18, %v3386_v60  ;;  %v588_v22 = vcombine.high %v586_v19, %v586_v19 }
 0x1d8   : > { %v602_v23 = vrot.slane %v586_v19, %v3386_v60  ;;  %v617_v25 = vcombine.high %v595_v20, %v595_v20  ;;  %v624_v32 = vrot.slane %v595_v20, %v3353_v27  ;;  %v3457_v20 = vstv %s3011_s21 }
 0x1d9   : > { %v1341_v1 = vrot.slane %v1327_v62, %v3386_v60  ;;  %v1342_v2 = vcombine.high %v1334_v63, %v1334_v63  ;;  %v3396_v4 = vrot.slane %v1334_v63, %v3386_v60  ;;  %v619_v29 = vcombine.high %v609_v21, %v609_v21 }
 0x1da   : > { %v3398_v5 = vpop.f32.mrb[4].mxu1  ;;  %v616_v30 = vrot.slane %v588_v22, %v3386_v60  ;;  %v618_v31 = vcombine.high %v602_v23, %v602_v23  ;;  %v628_v33 = vrot.slane %v609_v21, %v3353_v27  ;;  %v632_v34 = vrot.slane %v617_v25, %v3353_v27 }
 0x1db   : > { %4574 = vst [vmem:[#allocation4_spill] sm:$0xff] %v3398_v5  ;;  %v1343_v7 = vcombine.high %v1341_v1, %v1341_v1  ;;  %v3401_v8 = vrot.slane %v1341_v1, %v3386_v60  ;;  %v3404_v9 = vrot.slane %v1342_v2, %v3386_v60  ;;  %v2763_v10 = vpop.f32.mrb[5].mxu1  ;;  %v3408_v11 = vrot.slane %v3398_v5, %v3386_v60 }
 0x1dc   : > { %v636_v35 = vrot.slane %v619_v29, %v3353_v27  ;;  %v620_v36 = vcombine.high %v616_v30, %v616_v30  ;;  %v640_v37 = vrot.slane %v602_v23, %v3353_v27  ;;  %v644_v38 = vrot.slane %v616_v30, %v3353_v27 }
 0x1dd   : > { %v3411_v12 = vrot.slane %v1343_v7, %v3386_v60  ;;  %v1383_v13 = vcombine.high %v3408_v11, %v3408_v11  ;;  %v648_v45 = vrot.slane %v618_v31, %v3353_v27 }
 0x1de   : > { %v652_v57 = vrot.slane %v620_v36, %v3353_v27 }
 0x1df   : > { %v3418_v15 = vrot.slane %v1383_v13, %v3386_v60 }
 0x245   : > { %v662_v39 = vpop.permute.xlu0 %661 }
 0x246   : > { %v664_v41 = vadd.f32 %v662_v39, %v624_v32  ;;  %v665_v42 = vadd.f32 %v662_v39, %v628_v33  ;;  %v666_v43 = vadd.f32 %v662_v39, %v632_v34  ;;  %v667_v44 = vadd.f32 %v662_v39, %v636_v35 }
 0x247   : > { %v668_v48 = vadd.f32 %v662_v39, %v640_v37  ;;  %v669_v50 = vadd.f32 %v662_v39, %v644_v38  ;;  %v670_v58 = vadd.f32 %v662_v39, %v648_v45  ;;  %v671_v7 = vadd.f32 %v662_v39, %v652_v57  ;;  %v3525_v45 = vld [vmem:[%s4552_s4 + $0x30] sm:$0xff] }
 0x248   : > { %v675_v51 = vadd.f32 %v3435_v40, %v664_v41  ;;  %v676_v53 = vadd.f32 %v3435_v40, %v665_v42  ;;  %v677_v54 = vadd.f32 %v3435_v40, %v666_v43  ;;  %v678_v56 = vadd.f32 %v3435_v40, %v667_v44  ;;  %v3504_v42 = vld [vmem:[%s4552_s4] sm:$0xff]  ;;  %v3509_v43 = vld [vmem:[%s4552_s4 + $0x10] sm:$0xff] }
 0x249   : > { %v679_v0 = vadd.f32 %v3435_v40, %v668_v48  ;;  %v680_v2 = vadd.f32 %v3435_v40, %v669_v50  ;;  %v681_v13 = vadd.f32 %v3435_v40, %v670_v58  ;;  %v682_v17 = vadd.f32 %v3435_v40, %v671_v7  ;;  %v3536_v50 = vld [vmem:[%s4552_s4 + $0x40] sm:$0xff]  ;;  %v3559_v57 = vld [vmem:[%s4552_s4 + $0x70] sm:$0xff] }
 0x24a   : > { %v690_v59 = vmul.f32 %v3438_v47, %v675_v51  ;;  %v691_v62 = vmul.f32 %v3438_v47, %v676_v53  ;;  %v692_v63 = vmul.f32 %v3438_v47, %v677_v54  ;;  %v693_v1 = vmul.f32 %v3438_v47, %v678_v56  ;;  %v3541_v51 = vld [vmem:[%s4552_s4 + $0x50] sm:$0xff]  ;;  %v3554_v56 = vld [vmem:[%s4552_s4 + $0x60] sm:$0xff] }
 0x24b   : > { %v694_v10 = vmul.f32 %v3438_v47, %v679_v0  ;;  %v695_v16 = vmul.f32 %v3438_v47, %v680_v2  ;;  %v696_v18 = vmul.f32 %v3438_v47, %v681_v13  ;;  %v697_v19 = vmul.f32 %v3438_v47, %v682_v17  ;;  %4578 = vst [vmem:[#allocation8_spill] sm:$0xff] %v3554_v56  ;;  %v558_v0 = vld [vmem:[%s3577_s26] sm:$0xff]  ;;  %v559_v2 = vld [vmem:[%s3577_s26 + $0x8] sm:$0xff] }
 0x24c   : > { %3073 = vtanh.f32 %v690_v59  ;;  %v3513_v44 = vpack.c.bf16 %v3509_v43, %v3504_v42  ;;  %v3545_v53 = vpack.c.bf16 %v3541_v51, %v3536_v50  ;;  %v3565_v59 = vpack.c.bf16 %v3559_v57, %v3554_v56 }
 0x24d   : > { %3075 = vtanh.f32 %v691_v62  ;;  %v1372_v17 = vcombine.high %v3396_v4, %v3396_v4 }
 0x24e   : > { %3077 = vtanh.f32 %v692_v63  ;;  %4575 = vst [vmem:[#allocation5_spill] sm:$0xff] %v3513_v44  ;;  %2892 = vmatpush3.bf16.msra.mxu1 %v3513_v44  ;;  %4577 = vst [vmem:[#allocation7_spill] sm:$0xff] %v3545_v53 }
 0x24f   : > { %3079 = vtanh.f32 %v693_v1  ;;  %2893 = vmatprep.subr.bf16.mxu1 %v4556_v3  ;;  %4579 = vst [vmem:[#allocation9_spill] sm:$0xff] %v3565_v59 }
 0x250   : > { %3081 = vtanh.f32 %v694_v10 }
 0x251   : > { %3083 = vtanh.f32 %v695_v16 }
 0x252   : > { %3085 = vtanh.f32 %v696_v18 }
 0x253   : > { %3087 = vtanh.f32 %v697_v19  ;;  %v560_v19 = vld [vmem:[%s3577_s26 + $0x10] sm:$0xff] }
 0x256   : > { %v3074_v21 = vpop.eup %3073 }
 0x257   : > { %v3076_v22 = vpop.eup %3075  ;;  %v713_v23 = vmul.f32 %v3074_v21, %v3457_v20  ;;  %v3592_v21 = vrot.slane %v3396_v4, %v3353_v27  ;;  %v1374_v4 = vcombine.high %v3404_v9, %v3404_v9 }
 0x258   : > { %v3078_v25 = vpop.eup %3077  ;;  %v714_v29 = vmul.f32 %v3076_v22, %v3457_v20 }
 0x259   : > { %v3080_v30 = vpop.eup %3079  ;;  %729 = vrot.lane.b32.xlu0 %v713_v23, %s3255_s22  ;;  %v3464_v31 = vmul.f32 %v3078_v25, %v3457_v20  ;;  %v561_v25 = vld [vmem:[%s3577_s26 + $0x18] sm:$0xff] }
 0x25a   : > { %731 = vrot.lane.b32.xlu1 %v714_v29, %s3255_s22  ;;  %v3082_v32 = vpop.eup %3081  ;;  %v3467_v33 = vmul.f32 %v3080_v30, %v3457_v20 }
 0x25b   : > { %v3084_v34 = vpop.eup %3083  ;;  %v3474_v35 = vmul.f32 %v3082_v32, %v3457_v20 }
 0x25c   : > { %v3086_v36 = vpop.eup %3085  ;;  %v3477_v37 = vmul.f32 %v3084_v34, %v3457_v20 }
 0x25d   : > { %733 = vrot.lane.b32.xlu0 %v3464_v31, %s3255_s22  ;;  %v3088_v38 = vpop.eup %3087  ;;  %v3484_v39 = vmul.f32 %v3086_v36, %v3457_v20 }
 0x25e   : > { %735 = vrot.lane.b32.xlu1 %v3467_v33, %s3255_s22  ;;  %v3487_v41 = vmul.f32 %v3088_v38, %v3457_v20 }
 0x261   : > { %737 = vrot.lane.b32.xlu0 %v3474_v35, %s3255_s22 }
 0x262   : > { %739 = vrot.lane.b32.xlu1 %v3477_v37, %s3255_s22 }
 0x265   : > { %741 = vrot.lane.b32.xlu0 %v3484_v39, %s3255_s22 }
 0x266   : > { %743 = vrot.lane.b32.xlu1 %v3487_v41, %s3255_s22 }
 0x269   : > { %922 = vrot.lane.b32.xlu0 %v3361_v46, %s3255_s22 }
 0x26a   : > { %1448 = vrot.lane.b32.xlu1 %v3388_v61, %s3251_s11 }
 0x26d   : > { %1450 = vrot.lane.b32.xlu0 %v3398_v5, %s3251_s11 }
 0x26e   : > { %567 = vrot.lane.b32.xlu1 %v3356_v28, %s3255_s22  ;;  %v3520_v28 = vld [vmem:[%s4552_s4 + $0x20] sm:$0xff] }
 0x26f   : > { %v3529_v48 = vpack.c.bf16 %v3525_v45, %v3520_v28 }
 0x271   : > { %4576 = vst [vmem:[#allocation6_spill] sm:$0xff] %v3529_v48  ;;  %2895 = vmatpush3.bf16.msra.mxu1 %v3529_v48  ;;  %v565_v48 = vld [vmem:[%s3577_s26 + $0x38] sm:$0xff] }
 0x272   : > { %2896 = vmatprep.subr.bf16.mxu1 %v4556_v3 }
 0x275   : > { %2898 = vmatpush3.bf16.msra.mxu1 %v3545_v53 }
 0x276   : > { %2899 = vmatprep.subr.bf16.mxu1 %v4556_v3 }
 0x279   : > { %2901 = vmatpush3.bf16.msra.mxu1 %v3565_v59 }
 0x27a   : > { %2902 = vmatprep.subr.bf16.mxu1 %v4556_v3 }
 0x2cb   : > { %v730_v1 = vpop.permute.xlu0 %729 }
 0x2cc   : > { %v753_v7 = vsel %vm345_vm1, %v713_v23, %v730_v1  ;;  %v732_v10 = vpop.permute.xlu1 %731 }
 0x2cd   : > { %v3582_v13 = vadd.f32 %v753_v7, %v558_v0  ;;  %v754_v16 = vsel %vm345_vm1, %v714_v29, %v732_v10  ;;  %v3614_v7 = vrot.slane %v1372_v17, %v3353_v27 }
 0x2ce   : > { %v3587_v18 = vadd.f32 %v754_v16, %v559_v2  ;;  %v3611_v2 = vrot.slane %v3404_v9, %v3353_v27  ;;  %v562_v16 = vld [vmem:[%s3577_s26 + $0x20] sm:$0xff] }
 0x2cf   : > { %v770_v22 = vsel %vm769_vm5, %v3582_v13, -inf  ;;  %v734_v23 = vpop.permute.xlu0 %733 }
 0x2d0   : > { %v771_v29 = vrot.slane %v770_v22, 4  ;;  %v777_v32 = vsel %vm769_vm5, %v3587_v18, -inf  ;;  %v755_v34 = vsel %vm345_vm1, %v3464_v31, %v734_v23  ;;  %v736_v36 = vpop.permute.xlu1 %735  ;;  %v3643_v23 = vrot.slane %v3411_v12, %v3353_v27 }
 0x2d1   : > { %v778_v38 = vrot.slane %v777_v32, 4  ;;  %v3605_v0 = vadd.f32 %v755_v34, %v560_v19  ;;  %v756_v1 = vsel %vm345_vm1, %v3467_v33, %v736_v36  ;;  %v3623_v19 = vrot.slane %v3401_v8, %v3353_v27  ;;  %v563_v36 = vld [vmem:[%s3577_s26 + $0x28] sm:$0xff] }
 0x2d2   : > { %v772_v10 = vmax.f32 %v770_v22, %v771_v29  ;;  %v3616_v31 = vadd.f32 %v756_v1, %v561_v25 }
 0x2d3   : > { %v779_v34 = vmax.f32 %v777_v32, %v778_v38  ;;  %v784_v33 = vsel %vm769_vm5, %v3605_v0, -inf  ;;  %v738_v9 = vpop.permute.xlu0 %737  ;;  %v3637_v38 = vrot.slane %v1374_v4, %v3353_v27 }
 0x2d4   : > { %v773_v3 = vrot.slane %v772_v10, 2  ;;  %v785_v17 = vrot.slane %v784_v33, 4  ;;  %v791_v22 = vsel %vm769_vm5, %v3616_v31, -inf  ;;  %v757_v25 = vsel %vm345_vm1, %v3474_v35, %v738_v9  ;;  %v740_v29 = vpop.permute.xlu1 %739 }
 0x2d5   : > { %v780_v1 = vrot.slane %v779_v34, 2  ;;  %v792_v63 = vrot.slane %v791_v22, 4  ;;  %v3632_v62 = vadd.f32 %v757_v25, %v562_v16  ;;  %v758_v32 = vsel %vm345_vm1, %v3477_v37, %v740_v29  ;;  %v564_v25 = vld [vmem:[%s3577_s26 + $0x30] sm:$0xff] }
 0x2d6   : > { %v774_v58 = vmax.f32 %v772_v10, %v773_v3  ;;  %v786_v54 = vmax.f32 %v784_v33, %v785_v17  ;;  %v3639_v6 = vadd.f32 %v758_v32, %v563_v36 }
 0x2d7   : > { %v781_v35 = vmax.f32 %v779_v34, %v780_v1  ;;  %v793_v9 = vmax.f32 %v791_v22, %v792_v63  ;;  %v798_v16 = vsel %vm769_vm5, %v3632_v62, -inf  ;;  %v742_v14 = vpop.permute.xlu0 %741 }
 0x2d8   : > { %v775_v30 = vrot.slane %v774_v58, 1  ;;  %v787_v37 = vrot.slane %v786_v54, 2  ;;  %v799_v4 = vrot.slane %v798_v16, 4  ;;  %v805_v3 = vsel %vm769_vm5, %v3639_v6, -inf  ;;  %v744_v10 = vpop.permute.xlu1 %743 }
 0x2d9   : > { %v782_v33 = vrot.slane %v781_v35, 1  ;;  %v794_v36 = vrot.slane %v793_v9, 2  ;;  %v806_v17 = vrot.slane %v805_v3, 4  ;;  %v759_v34 = vsel %vm345_vm1, %v3484_v39, %v742_v14 }
 0x2da   : > { %v776_v63 = vmax.f32 %v774_v58, %v775_v30  ;;  %v788_v22 = vmax.f32 %v786_v54, %v787_v37  ;;  %v800_v29 = vmax.f32 %v798_v16, %v799_v4  ;;  %v3652_v1 = vadd.f32 %v759_v34, %v564_v25 }
 0x2db   : > { %v783_v32 = vmax.f32 %v781_v35, %v782_v33  ;;  %v795_v59 = vmax.f32 %v793_v9, %v794_v36  ;;  %v807_v53 = vmax.f32 %v805_v3, %v806_v17  ;;  %v760_v24 = vsel %vm345_vm1, %v3487_v41, %v744_v10  ;;  %v923_v25 = vpop.permute.xlu0 %922 }
 0x2dc   : > { %v826_v26 = vsub.f32 %v3582_v13, %v776_v63  ;;  %v789_v44 = vrot.slane %v788_v22, 1  ;;  %v801_v5 = vrot.slane %v800_v29, 2  ;;  %v812_v56 = vsel %vm769_vm5, %v3652_v1, -inf  ;;  %v3679_v34 = vpop.permute.xlu1 %1448 }
 0x2dd   : > { %v827_v14 = vsub.f32 %v3587_v18, %v783_v32  ;;  %v796_v39 = vrot.slane %v795_v59, 1  ;;  %v808_v54 = vrot.slane %v807_v53, 2  ;;  %v813_v58 = vrot.slane %v812_v56, 4 }
 0x2de   : > { %v834_v30 = vmul.f32 1.442695, %v826_v26  ;;  %v790_v35 = vmax.f32 %v788_v22, %v789_v44  ;;  %v802_v9 = vmax.f32 %v800_v29, %v801_v5  ;;  %v3661_v16 = vadd.f32 %v760_v24, %v565_v48 }
 0x2df   : > { %v836_v37 = vmul.f32 1.442695, %v827_v14  ;;  %v797_v41 = vmax.f32 %v795_v59, %v796_v39  ;;  %v809_v4 = vmax.f32 %v807_v53, %v808_v54  ;;  %v814_v13 = vmax.f32 %v812_v56, %v813_v58  ;;  %v3688_v32 = vpop.permute.xlu0 %1450 }
 0x2e0   : > { %3089 = vpow2.f32 %v834_v30  ;;  %v828_v3 = vsub.f32 %v3605_v0, %v790_v35  ;;  %v803_v10 = vrot.slane %v802_v9, 1  ;;  %v819_v18 = vsel %vm769_vm5, %v3661_v16, -inf }
 0x2e1   : > { %3091 = vpow2.f32 %v836_v37  ;;  %v829_v33 = vsub.f32 %v3616_v31, %v797_v41  ;;  %v810_v26 = vrot.slane %v809_v4, 1  ;;  %v815_v44 = vrot.slane %v814_v13, 2 }
 0x2e2   : > { %v4580_v24 = vcombine.high %v3401_v8, %v3401_v8  ;;  %v838_v48 = vmul.f32 1.442695, %v828_v3  ;;  %v804_v53 = vmax.f32 %v802_v9, %v803_v10  ;;  %v820_v56 = vrot.slane %v819_v18, 4 }
 0x2e3   : > { %v4581_v59 = vrot.slane %v3408_v11, %v3386_v60  ;;  %v840_v36 = vmul.f32 1.442695, %v829_v33  ;;  %v811_v17 = vmax.f32 %v809_v4, %v810_v26  ;;  %v816_v31 = vmax.f32 %v814_v13, %v815_v44 }
 0x2e4   : > { %v3671_v5 = vrot.slane %v4580_v24, %v3353_v27  ;;  %v4582_v8 = vcombine.high %v3411_v12, %v3411_v12  ;;  %3093 = vpow2.f32 %v838_v48  ;;  %v830_v22 = vsub.f32 %v3632_v62, %v804_v53 }
 0x2e5   : > { %v3677_v0 = vrot.slane %v4581_v59, %v3353_v27  ;;  %v821_v29 = vmax.f32 %v819_v18, %v820_v56  ;;  %3095 = vpow2.f32 %v840_v36  ;;  %v831_v60 = vsub.f32 %v3639_v6, %v811_v17 }
 0x2e6   : > { %v3685_v63 = vrot.slane %v4582_v8, %v3353_v27  ;;  %v817_v11 = vrot.slane %v816_v31, 1  ;;  %v3693_v14 = vsel %vm345_vm1, %v3361_v46, %v923_v25  ;;  %v842_v39 = vmul.f32 1.442695, %v830_v22 }
 0x2e7   : > { %v822_v54 = vrot.slane %v821_v29, 2  ;;  %v1454_v12 = vadd.f32 %v3679_v34, %v3592_v21  ;;  %v1456_v58 = vadd.f32 %v3679_v34, %v3611_v2  ;;  %v844_v62 = vmul.f32 1.442695, %v831_v60 }
 0x2e8   : > { %v818_v30 = vmax.f32 %v816_v31, %v817_v11  ;;  %v1455_v35 = vadd.f32 %v3688_v32, %v3592_v21  ;;  %v1458_v6 = vadd.f32 %v3679_v34, %v3614_v7  ;;  %3097 = vpow2.f32 %v842_v39 }
 0x2e9   : > { %v823_v9 = vmax.f32 %v821_v29, %v822_v54  ;;  %v1474_v46 = vadd.f32 %v1454_v12, %v3435_v40  ;;  %v1476_v25 = vadd.f32 %v1456_v58, %v3435_v40  ;;  %3099 = vpow2.f32 %v844_v62 }
 0x2ea   : > { %v832_v37 = vsub.f32 %v3652_v1, %v818_v30  ;;  %v1475_v41 = vadd.f32 %v1455_v35, %v3435_v40  ;;  %v1478_v4 = vadd.f32 %v1458_v6, %v3435_v40  ;;  %v3708_v13 = vpop.eup %3089  ;;  %v1457_v18 = vadd.f32 %v3688_v32, %v3611_v2 }
 0x2eb   : > { %v824_v3 = vrot.slane %v823_v9, 1  ;;  %v1494_v21 = vmul.f32 %v1474_v46, %v3438_v47  ;;  %v1496_v10 = vmul.f32 %v1476_v25, %v3438_v47  ;;  %v3714_v33 = vpop.eup %3091  ;;  %v850_v26 = vsel %vm769_vm5, %v3708_v13, 0.0 }
 0x2ec   : > { %v846_v1 = vmul.f32 1.442695, %v832_v37  ;;  %v1495_v44 = vmul.f32 %v1475_v41, %v3438_v47  ;;  %v1498_v24 = vmul.f32 %v1478_v4, %v3438_v47  ;;  %v851_v48 = vrot.slane %v850_v26, 4 }
 0x2ed   : > { %v857_v53 = vsel %vm769_vm5, %v3714_v33, 0.0  ;;  %v825_v56 = vmax.f32 %v823_v9, %v824_v3  ;;  %3101 = vtanh.f32 %v1494_v21  ;;  %v1477_v2 = vadd.f32 %v1457_v18, %v3435_v40 }
 0x2ee   : > { %v858_v59 = vrot.slane %v857_v53, 4  ;;  %3103 = vpow2.f32 %v846_v1  ;;  %v1460_v36 = vadd.f32 %v3679_v34, %v3637_v38  ;;  %v3725_v17 = vpop.eup %3093  ;;  %v852_v31 = vadd.f32 %v851_v48, %v850_v26 }
 0x2ef   : > { %v833_v8 = vsub.f32 %v3661_v16, %v825_v56  ;;  %3105 = vtanh.f32 %v1496_v10  ;;  %v1459_v22 = vadd.f32 %v3688_v32, %v3614_v7  ;;  %v3730_v29 = vpop.eup %3095  ;;  %v864_v11 = vsel %vm769_vm5, %v3725_v17, 0.0 }
 0x2f0   : > { %v859_v60 = vadd.f32 %v858_v59, %v857_v53  ;;  %3107 = vtanh.f32 %v1495_v44  ;;  %v1497_v39 = vmul.f32 %v1477_v2, %v3438_v47  ;;  %v853_v54 = vrot.slane %v852_v31, 2 }
 0x2f1   : > { %v865_v12 = vrot.slane %v864_v11, 4  ;;  %v871_v58 = vsel %vm769_vm5, %v3730_v29, 0.0  ;;  %v848_v62 = vmul.f32 1.442695, %v833_v8  ;;  %3109 = vtanh.f32 %v1498_v24 }
 0x2f2   : > { %v860_v16 = vrot.slane %v859_v60, 2  ;;  %v872_v30 = vrot.slane %v871_v58, 4  ;;  %v1480_v7 = vadd.f32 %v1460_v36, %v3435_v40  ;;  %v3738_v35 = vpop.eup %3097  ;;  %v854_v6 = vadd.f32 %v853_v54, %v852_v31 }
 0x2f3   : > { %v866_v9 = vadd.f32 %v865_v12, %v864_v11  ;;  %3111 = vpow2.f32 %v848_v62  ;;  %v1479_v46 = vadd.f32 %v1459_v22, %v3435_v40  ;;  %v3741_v25 = vpop.eup %3099  ;;  %v878_v4 = vsel %vm769_vm5, %v3738_v35, 0.0 }
 0x2f4   : > { %v861_v37 = vadd.f32 %v860_v16, %v859_v60  ;;  %v873_v41 = vadd.f32 %v872_v30, %v871_v58  ;;  %3113 = vtanh.f32 %v1497_v39  ;;  %v855_v3 = vrot.slane %v854_v6, 1 }
 0x2f5   : > { %v867_v21 = vrot.slane %v866_v9, 2  ;;  %v879_v10 = vrot.slane %v878_v4, 4  ;;  %v885_v18 = vsel %vm769_vm5, %v3741_v25, 0.0  ;;  %v1500_v24 = vmul.f32 %v1480_v7, %v3438_v47 }
 0x2f6   : > { %v862_v26 = vrot.slane %v861_v37, 1  ;;  %v874_v1 = vrot.slane %v873_v41, 2  ;;  %v886_v44 = vrot.slane %v885_v18, 4  ;;  %v856_v53 = vadd.f32 %v855_v3, %v854_v6 }
 0x2f7   : > { %v3102_v48 = vpop.eup %3101  ;;  %v868_v56 = vadd.f32 %v867_v21, %v866_v9  ;;  %v880_v59 = vadd.f32 %v879_v10, %v878_v4  ;;  %v1499_v2 = vmul.f32 %v1479_v46, %v3438_v47 }
 0x2f8   : > { %v3749_v36 = vpop.eup %3103  ;;  %v863_v31 = vadd.f32 %v862_v26, %v861_v37  ;;  %v875_v8 = vadd.f32 %v874_v1, %v873_v41  ;;  %v887_v22 = vadd.f32 %v886_v44, %v885_v18  ;;  %v3752_v60 = vmul.f32 %v3102_v48, %v3457_v20 }
 0x2f9   : > { %v3106_v11 = vpop.eup %3105  ;;  %3115 = vrcp.f32 %v856_v53  ;;  %v869_v39 = vrot.slane %v868_v56, 1  ;;  %v881_v54 = vrot.slane %v880_v59, 2  ;;  %v892_v12 = vsel %vm769_vm5, %v3749_v36, 0.0 }
 0x2fa   : > { %v3108_v58 = vpop.eup %3107  ;;  %3117 = vrcp.f32 %v863_v31  ;;  %v876_v62 = vrot.slane %v875_v8, 1  ;;  %v888_v16 = vrot.slane %v887_v22, 2  ;;  %v893_v30 = vrot.slane %v892_v12, 4  ;;  %1574 = vrot.lane.b32.xlu0 %v3752_v60, %s3255_s22 }
 0x2fb   : > { %v870_v7 = vadd.f32 %v869_v39, %v868_v56  ;;  %v882_v6 = vadd.f32 %v881_v54, %v880_v59  ;;  %v3759_v9 = vmul.f32 %v3106_v11, %v3457_v20  ;;  %v3762_v46 = vmul.f32 %v3108_v58, %v3457_v20  ;;  %v3110_v37 = vpop.eup %3109 }
 0x2fc   : > { %v877_v41 = vadd.f32 %v876_v62, %v875_v8  ;;  %v889_v4 = vadd.f32 %v888_v16, %v887_v22  ;;  %v894_v3 = vadd.f32 %v893_v30, %v892_v12  ;;  %3119 = vtanh.f32 %v1500_v24 }
 0x2fd   : > { %v3764_v21 = vpop.eup %3111  ;;  %3121 = vrcp.f32 %v870_v7  ;;  %v883_v10 = vrot.slane %v882_v6, 1  ;;  %1576 = vrot.lane.b32.xlu1 %v3762_v46, %s3255_s22  ;;  %v3769_v18 = vmul.f32 %v3110_v37, %v3457_v20  ;;  %v1462_v26 = vadd.f32 %v3679_v34, %v3623_v19 }
 0x2fe   : > { %v3114_v1 = vpop.eup %3113  ;;  %3123 = vrcp.f32 %v877_v41  ;;  %v890_v44 = vrot.slane %v889_v4, 1  ;;  %v895_v48 = vrot.slane %v894_v3, 2  ;;  %v899_v24 = vsel %vm769_vm5, %v3764_v21, 0.0  ;;  %1578 = vrot.lane.b32.xlu0 %v3759_v9, %s3255_s22 }
 0x2ff   : > { %v884_v53 = vadd.f32 %v883_v10, %v882_v6  ;;  %v900_v56 = vrot.slane %v899_v24, 4  ;;  %v3778_v59 = vmul.f32 %v3114_v1, %v3457_v20  ;;  %3125 = vtanh.f32 %v1499_v2 }
 0x300   : > { %v891_v31 = vadd.f32 %v890_v44, %v889_v4  ;;  %v896_v8 = vadd.f32 %v895_v48, %v894_v3  ;;  %v1482_v22 = vadd.f32 %v1462_v26, %v3435_v40  ;;  %v1461_v11 = vadd.f32 %v3688_v32, %v3637_v38 }
 0x301   : > { %3127 = vrcp.f32 %v884_v53  ;;  %v901_v39 = vadd.f32 %v900_v56, %v899_v24  ;;  %1580 = vrot.lane.b32.xlu1 %v3778_v59, %s3255_s22  ;;  %v1464_v54 = vadd.f32 %v3679_v34, %v3643_v23  ;;  %v1463_v12 = vadd.f32 %v3688_v32, %v3623_v19 }
 0x302   : > { %3129 = vrcp.f32 %v891_v31  ;;  %v897_v2 = vrot.slane %v896_v8, 1  ;;  %1582 = vrot.lane.b32.xlu0 %v3769_v18, %s3255_s22  ;;  %v1502_v58 = vmul.f32 %v1482_v22, %v3438_v47  ;;  %v1481_v38 = vadd.f32 %v1461_v11, %v3435_v40 }
 0x303   : > { %v3116_v62 = vpop.eup %3115  ;;  %v902_v16 = vrot.slane %v901_v39, 2  ;;  %v1484_v30 = vadd.f32 %v1464_v54, %v3435_v40  ;;  %v1483_v7 = vadd.f32 %v1463_v12, %v3435_v40  ;;  %v1466_v6 = vadd.f32 %v3679_v34, %v3671_v5 }
 0x304   : > { %v3118_v37 = vpop.eup %3117  ;;  %v914_v19 = vmul.f32 %v3116_v62, %v3708_v13  ;;  %v898_v41 = vadd.f32 %v897_v2, %v896_v8  ;;  %3131 = vtanh.f32 %v1502_v58  ;;  %v1501_v4 = vmul.f32 %v1481_v38, %v3438_v47 }
 0x305   : > { %v915_v3 = vmul.f32 %v3118_v37, %v3714_v33  ;;  %v903_v10 = vadd.f32 %v902_v16, %v901_v39  ;;  %v1504_v26 = vmul.f32 %v1484_v30, %v3438_v47  ;;  %v1503_v1 = vmul.f32 %v1483_v7, %v3438_v47 }
 0x306   : > { %v3120_v44 = vpop.eup %3119  ;;  %3133 = vrcp.f32 %v898_v41  ;;  %v926_v48 = vmul.f32 %v3693_v14, %v914_v19  ;;  %v1486_v24 = vadd.f32 %v1466_v6, %v3435_v40  ;;  %v1465_v13 = vadd.f32 %v3688_v32, %v3643_v23 }
 0x307   : > { %v3122_v53 = vpop.eup %3121  ;;  %v904_v56 = vrot.slane %v903_v10, 1  ;;  %v927_v31 = vmul.f32 %v3693_v14, %v915_v3  ;;  %v3808_v33 = vmul.f32 %v3120_v44, %v3457_v20  ;;  %3135 = vtanh.f32 %v1501_v4 }
 0x308   : > { %v3124_v8 = vpop.eup %3123  ;;  %v916_v22 = vmul.f32 %v3122_v53, %v3725_v17  ;;  %v934_v11 = vsel %vm769_vm5, %v926_v48, 0.0  ;;  %3137 = vtanh.f32 %v1504_v26  ;;  %v1506_v39 = vmul.f32 %v1486_v24, %v3438_v47 }
 0x309   : > { %v3126_v54 = vpop.eup %3125  ;;  %v917_v12 = vmul.f32 %v3124_v8, %v3730_v29  ;;  %v905_v23 = vadd.f32 %v904_v56, %v903_v10  ;;  %v935_v2 = vrot.slane %v934_v11, 4  ;;  %v941_v58 = vsel %vm769_vm5, %v927_v31, 0.0  ;;  %1586 = vrot.lane.b32.xlu0 %v3808_v33, %s3255_s22 }
 0x30a   : > { %v928_v38 = vmul.f32 %v3693_v14, %v916_v22  ;;  %v942_v62 = vrot.slane %v941_v58, 4  ;;  %v3819_v17 = vmul.f32 %v3126_v54, %v3457_v20  ;;  %3139 = vtanh.f32 %v1503_v1 }
 0x30b   : > { %v3128_v16 = vpop.eup %3127  ;;  %3141 = vrcp.f32 %v905_v23  ;;  %v929_v30 = vmul.f32 %v3693_v14, %v917_v12  ;;  %v936_v7 = vadd.f32 %v935_v2, %v934_v11  ;;  %v1485_v29 = vadd.f32 %v1465_v13, %v3435_v40 }
 0x30c   : > { %v3130_v6 = vpop.eup %3129  ;;  %v918_v37 = vmul.f32 %v3128_v16, %v3738_v35  ;;  %v943_v19 = vadd.f32 %v942_v62, %v941_v58  ;;  %v948_v41 = vsel %vm769_vm5, %v928_v38, 0.0  ;;  %1584 = vrot.lane.b32.xlu1 %v3819_v17, %s3255_s22  ;;  %3143 = vtanh.f32 %v1506_v39 }
 0x30d   : > { %v919_v4 = vmul.f32 %v3130_v6, %v3741_v25  ;;  %v937_v3 = vrot.slane %v936_v7, 2  ;;  %v949_v10 = vrot.slane %v948_v41, 4  ;;  %v955_v26 = vsel %vm769_vm5, %v929_v30, 0.0 }
 0x30e   : > { %v3132_v1 = vpop.eup %3131  ;;  %v930_v44 = vmul.f32 %v3693_v14, %v918_v37  ;;  %v944_v48 = vrot.slane %v943_v19, 2  ;;  %v956_v24 = vrot.slane %v955_v26, 4  ;;  %v1505_v35 = vmul.f32 %v1485_v29, %v3438_v47 }
 0x30f   : > { %v1437_v13 = vrot.slane %v3418_v15, %v3353_v27  ;;  %v3834_v53 = vmul.f32 %v3693_v14, %v919_v4  ;;  %v950_v56 = vadd.f32 %v949_v10, %v948_v41  ;;  %v3837_v25 = vmul.f32 %v3132_v1, %v3457_v20 }
 0x310   : > { %v3134_v31 = vpop.eup %3133  ;;  %v938_v8 = vadd.f32 %v937_v3, %v936_v7  ;;  %v945_v22 = vadd.f32 %v944_v48, %v943_v19  ;;  %v962_v11 = vsel %vm769_vm5, %v930_v44, 0.0  ;;  %3145 = vtanh.f32 %v1505_v35 }
 0x311   : > { %v3136_v39 = vpop.eup %3135  ;;  %v920_v54 = vmul.f32 %v3134_v31, %v3749_v36  ;;  %v951_v12 = vrot.slane %v950_v56, 2  ;;  %v957_v23 = vadd.f32 %v956_v24, %v955_v26  ;;  %1590 = vrot.lane.b32.xlu0 %v3837_v25, %s3255_s22  ;;  %v1468_v27 = vadd.f32 %v3679_v34, %v3685_v63 }
 0x312   : > { %v3138_v15 = vpop.eup %3137  ;;  %v3846_v2 = vmul.f32 %v3136_v39, %v3457_v20  ;;  %v1467_v58 = vadd.f32 %v3688_v32, %v3671_v5  ;;  %v1469_v38 = vadd.f32 %v3688_v32, %v3685_v63  ;;  %v1470_v36 = vadd.f32 %v3679_v34, %v3677_v0 }
 0x313   : > { %v963_v62 = vrot.slane %v962_v11, 4  ;;  %v3855_v16 = vmul.f32 %v3138_v15, %v3457_v20  ;;  %v1488_v30 = vadd.f32 %v1468_v27, %v3435_v40  ;;  %v1471_v7 = vadd.f32 %v3688_v32, %v3677_v0 }
 0x314   : > { %v3140_v29 = vpop.eup %3139  ;;  %1588 = vrot.lane.b32.xlu1 %v3846_v2, %s3255_s22  ;;  %v1487_v5 = vadd.f32 %v1467_v58, %v3435_v40  ;;  %v1489_v63 = vadd.f32 %v1469_v38, %v3435_v40  ;;  %v1490_v6 = vadd.f32 %v1470_v36, %v3435_v40  ;;  %v1472_v37 = vadd.f32 %v3679_v34, %v1437_v13 }
 0x315   : > { %v3142_v19 = vpop.eup %3141  ;;  %1594 = vrot.lane.b32.xlu0 %v3855_v16, %s3255_s22  ;;  %v3869_v41 = vmul.f32 %v3140_v29, %v3457_v20  ;;  %v1508_v0 = vmul.f32 %v1488_v30, %v3438_v47  ;;  %v1491_v4 = vadd.f32 %v1471_v7, %v3435_v40  ;;  %v1473_v3 = vadd.f32 %v3688_v32, %v1437_v13 }
 0x316   : > { %v3144_v10 = vpop.eup %3143  ;;  %v921_v26 = vmul.f32 %v3142_v19, %v3764_v21  ;;  %v1507_v1 = vmul.f32 %v1487_v5, %v3438_v47  ;;  %v1509_v34 = vmul.f32 %v1489_v63, %v3438_v47  ;;  %v1510_v44 = vmul.f32 %v1490_v6, %v3438_v47 }
 0x317   : > { %v3879_v48 = vmul.f32 %v3144_v10, %v3457_v20  ;;  %3147 = vtanh.f32 %v1508_v0  ;;  %v1511_v24 = vmul.f32 %v1491_v4, %v3438_v47  ;;  %v1492_v35 = vadd.f32 %v1472_v37, %v3435_v40 }
 0x318   : > { %v932_v32 = vmul.f32 %v3693_v14, %v920_v54  ;;  %1592 = vrot.lane.b32.xlu1 %v3869_v41, %s3255_s22  ;;  %3149 = vtanh.f32 %v1507_v1  ;;  %v1493_v21 = vadd.f32 %v1473_v3, %v3435_v40  ;;  %v939_v13 = vrot.slane %v938_v8, 1 }
 0x319   : > { %1598 = vrot.lane.b32.xlu0 %v3879_v48, %s3255_s22  ;;  %3151 = vtanh.f32 %v1509_v34  ;;  %v1512_v31 = vmul.f32 %v1492_v35, %v3438_v47  ;;  %v946_v39 = vrot.slane %v945_v22, 1  ;;  %v952_v27 = vadd.f32 %v951_v12, %v950_v56 }
 0x31a   : > { %v3146_v15 = vpop.eup %3145  ;;  %3153 = vtanh.f32 %v1510_v44  ;;  %v1513_v58 = vmul.f32 %v1493_v21, %v3438_v47  ;;  %v933_v54 = vmul.f32 %v3693_v14, %v921_v26  ;;  %v958_v38 = vrot.slane %v957_v23, 2 }
 0x31b   : > { %v3893_v36 = vmul.f32 %v3146_v15, %v3457_v20  ;;  %3155 = vtanh.f32 %v1511_v24  ;;  %v940_v40 = vadd.f32 %v939_v13, %v938_v8  ;;  %v953_v30 = vrot.slane %v952_v27, 1 }
 0x31c   : > { %v947_v7 = vadd.f32 %v946_v39, %v945_v22  ;;  %v959_v29 = vadd.f32 %v958_v38, %v957_v23  ;;  %v964_v5 = vadd.f32 %v963_v62, %v962_v11  ;;  %v969_v63 = vsel %vm769_vm5, %v3834_v53, 0.0 }
 0x31d   : > { %1596 = vrot.lane.b32.xlu1 %v3893_v36, %s3255_s22  ;;  %3157 = vtanh.f32 %v1512_v31  ;;  %v954_v47 = vadd.f32 %v953_v30, %v952_v27  ;;  %v970_v56 = vrot.slane %v969_v63, 4  ;;  %v976_v12 = vsel %vm769_vm5, %v932_v32, 0.0 }
 0x31e   : > { %v960_v6 = vrot.slane %v959_v29, 1  ;;  %v965_v37 = vrot.slane %v964_v5, 2  ;;  %v977_v19 = vrot.slane %v976_v12, 4  ;;  %v983_v8 = vsel %vm769_vm5, %v933_v54, 0.0 }
 0x31f   : > { %v971_v0 = vadd.f32 %v970_v56, %v969_v63  ;;  %v984_v22 = vrot.slane %v983_v8, 4  ;;  %3159 = vtanh.f32 %v1513_v58  ;;  %v1007_v10 = vsel %vm1006_vm6, %v947_v7, %v940_v40 }
 0x320   : > { %v966_v11 = vadd.f32 %v965_v37, %v964_v5  ;;  %v978_v23 = vadd.f32 %v977_v19, %v976_v12  ;;  %v961_v62 = vadd.f32 %v960_v6, %v959_v29  ;;  %v1009_v24 = vsel %vm1008_vm7, %v954_v47, %v1007_v10  ;;  %v4589_v10 = vld [vmem:[#allocation4_spill] sm:$0xff] }
 0x321   : > { %v3148_v53 = vpop.eup %3147  ;;  %v972_v4 = vrot.slane %v971_v0, 2  ;;  %v985_v3 = vadd.f32 %v984_v22, %v983_v8 }
 0x322   : > { %v3150_v26 = vpop.eup %3149  ;;  %v3903_v1 = vmul.f32 %v3148_v53, %v3457_v20  ;;  %v967_v34 = vrot.slane %v966_v11, 1  ;;  %v979_v44 = vrot.slane %v978_v23, 2  ;;  %v1011_v38 = vsel %vm1010_vm8, %v961_v62, %v1009_v24 }
 0x323   : > { %v3152_v35 = vpop.eup %3151  ;;  %v3907_v32 = vmul.f32 %v3150_v26, %v3457_v20  ;;  %v973_v21 = vadd.f32 %v972_v4, %v971_v0  ;;  %v986_v13 = vrot.slane %v985_v3, 2  ;;  %v568_v0 = vpop.permute.xlu1 %567  ;;  %v4584_v4 = vpack.i.bf16 %v3509_v43, %v3504_v42  ;;  %v4587_v43 = vld [vmem:[#allocation8_spill] sm:$0xff] }
 0x324   : > { %v3154_v31 = vpop.eup %3153  ;;  %1602 = vrot.lane.b32.xlu0 %v3903_v1, %s3255_s22  ;;  %v968_v39 = vadd.f32 %v967_v34, %v966_v11  ;;  %v980_v27 = vadd.f32 %v979_v44, %v978_v23  ;;  %v3919_v5 = vmul.f32 %v3152_v35, %v3457_v20  ;;  %v4583_v23 = vmov 0.0   ;;  %v1305_v44 = vld [vmem:[%s3982_s30 + $0x10] sm:$0xff] }
 0x325   : > { %v3156_v15 = vpop.eup %3155  ;;  %1600 = vrot.lane.b32.xlu1 %v3907_v32, %s3255_s22  ;;  %v974_v58 = vrot.slane %v973_v21, 1  ;;  %v987_v54 = vadd.f32 %v986_v13, %v985_v3  ;;  %v3915_v40 = vmul.f32 %v3154_v31, %v3457_v20  ;;  %v570_v53 = vadd.f32 %v568_v0, %v3381_v55  ;;  %v1306_v13 = vld [vmem:[%s3982_s30 + $0x18] sm:$0x3] }
 0x326   : > { %v981_v30 = vrot.slane %v980_v27, 1  ;;  %v1013_v7 = vsel %vm1012_vm9, %v968_v39, %v1011_v38  ;;  %v3931_v22 = vmul.f32 %v3156_v15, %v3457_v20  ;;  %v4585_v55 = vpack.i.bf16 %v3525_v45, %v3520_v28 }
 0x327   : > { %v3158_v29 = vpop.eup %3157  ;;  %v975_v63 = vadd.f32 %v974_v58, %v973_v21  ;;  %v988_v47 = vrot.slane %v987_v54, 1  ;;  %v1323_v42 = vadd.f32 %v568_v0, %v3388_v61  ;;  %v4588_v3 = vpack.i.bf16 %v3559_v57, %v4587_v43  ;;  %v1303_v61 = vld [vmem:[%s3982_s30] sm:$0xff] }
 0x328   : > { %1606 = vrot.lane.b32.xlu0 %v3915_v40, %s3255_s22  ;;  %v982_v56 = vadd.f32 %v981_v30, %v980_v27  ;;  %v3927_v19 = vmul.f32 %v3158_v29, %v3457_v20  ;;  %v1324_v28 = vadd.f32 %v568_v0, %v4589_v10 }
 0x329   : > { %1604 = vrot.lane.b32.xlu1 %v3919_v5, %s3255_s22  ;;  %v989_v12 = vadd.f32 %v988_v47, %v987_v54  ;;  %v1015_v6 = vsel %vm1014_vm10, %v975_v63, %v1013_v7  ;;  %v3160_v37 = vpop.eup %3159 }
 0x32a   : > { %v1017_v8 = vsel %vm1016_vm11, %v982_v56, %v1015_v6  ;;  %v3946_v62 = vmul.f32 %v3160_v37, %v3457_v20  ;;  %v4586_v20 = vpack.i.bf16 %v3541_v51, %v3536_v50  ;;  %v1304_v51 = vld [vmem:[%s3982_s30 + $0x8] sm:$0x3] }
 0x32b   : > { %v3934_v11 = vsel %vm1018_vm12, %v989_v12, %v1017_v8 }
 0x32c   : > { %1610 = vrot.lane.b32.xlu0 %v3927_v19, %s3255_s22  ;;  %2781 = vmatmul.mubr.msk.f32.vlgmr.msra.gmra.mrb[6].mxu1 %vm769_vm5, %v3934_v11 }
 0x32d   : > { %1608 = vrot.lane.b32.xlu1 %v3931_v22, %s3255_s22  ;;  %2799 = vmatprep.mubr.msk.f32.mxu1 %vm3249_vm0, %v4583_v23 }
 0x330   : > { %991 = vrot.lane.b32.xlu0 %v570_v53, %s3253_s19 }
 0x331   : > { %1612 = vrot.lane.b32.xlu1 %v3946_v62, %s3255_s22 }
 0x334   : > { %3040 = vrot.lane.b32.xlu0 %v4584_v4, %s3253_s19 }
 0x335   : > { %994 = vrot.lane.b32.xlu1 %v570_v53, %s3251_s11 }
 0x338   : > { %1945 = vrot.lane.b32.xlu0 %v3367_v49, %s3255_s22 }
 0x339   : > { %3045 = vrot.lane.b32.xlu1 %v4585_v55, %s3253_s19 }
 0x33c   : > { %3050 = vrot.lane.b32.xlu0 %v4586_v20, %s3253_s19  ;;  %v1308_v20 = vld [vmem:[%s3982_s30 + $0x28] sm:$0x3] }
 0x33d   : > { %1947 = vrot.lane.b32.xlu1 %v3373_v52, %s3255_s22 }
 0x340   : > { %2065 = vrot.lane.b32.xlu0 %v1323_v42, %s3253_s19 }
 0x341   : > { %3055 = vrot.lane.b32.xlu1 %v4588_v3, %s3253_s19 }
 0x344   : > { %2067 = vrot.lane.b32.xlu0 %v1324_v28, %s3253_s19 }
 0x345   : > { %2071 = vrot.lane.b32.xlu1 %v1323_v42, %s3251_s11 }
 0x349   : > { %2073 = vrot.lane.b32.xlu1 %v1324_v28, %s3251_s11  ;;  %v1307_v28 = vld [vmem:[%s3982_s30 + $0x20] sm:$0xff] }
 0x36c   : > { %v1575_v45 = vpop.permute.xlu0 %1574 }
 0x36d   : > { %v1634_v50 = vsel %vm345_vm1, %v3752_v60, %v1575_v45 }
 0x36e   : > { %v1654_v57 = vadd.f32 %v1634_v50, %v1303_v61  ;;  %v1310_v50 = vld [vmem:[%s3982_s30 + $0x38] sm:$0x3] }
 0x36f   : > { %v1577_v26 = vpop.permute.xlu1 %1576 }
 0x370   : > { %v1635_v34 = vsel %vm345_vm1, %v3762_v46, %v1577_v26  ;;  %v1579_v24 = vpop.permute.xlu0 %1578  ;;  %v1674_v31 = vsel %vm769_vm5, %v1654_v57, -inf }
 0x371   : > { %v1655_v35 = vadd.f32 %v1635_v34, %v1304_v51  ;;  %v1636_v21 = vsel %vm345_vm1, %v3759_v9, %v1579_v24 }
 0x372   : > { %v1656_v27 = vadd.f32 %v1636_v21, %v1305_v44  ;;  %v1309_v44 = vld [vmem:[%s3982_s30 + $0x30] sm:$0xff] }
 0x373   : > { %v1676_v39 = vsel %vm1675_vm13, %v1655_v35, -inf  ;;  %v1581_v60 = vpop.permute.xlu1 %1580 }
 0x374   : > { %v1677_v15 = vmax.f32 %v1674_v31, %v1676_v39  ;;  %v1637_v58 = vsel %vm345_vm1, %v3778_v59, %v1581_v60  ;;  %v1684_v46 = vsel %vm769_vm5, %v1656_v27, -inf  ;;  %v1583_v29 = vpop.permute.xlu0 %1582 }
 0x375   : > { %v1657_v54 = vadd.f32 %v1637_v58, %v1306_v13  ;;  %v1638_v61 = vsel %vm345_vm1, %v3769_v18, %v1583_v29  ;;  %v1314_v29 = vld [vmem:[%s3982_s30 + $0x58] sm:$0x3] }
 0x376   : > { %v1678_v38 = vrot.slane %v1677_v15, 4  ;;  %v4014_v21 = vadd.f32 %v1638_v61, %v1307_v28 }
 0x377   : > { %v1685_v30 = vsel %vm1675_vm13, %v1657_v54, -inf }
 0x378   : > { %v1679_v7 = vmax.f32 %v1677_v15, %v1678_v38  ;;  %v1686_v9 = vmax.f32 %v1684_v46, %v1685_v30  ;;  %v1693_v58 = vsel %vm769_vm5, %v4014_v21, -inf  ;;  %v1311_v46 = vld [vmem:[%s3982_s30 + $0x40] sm:$0xff] }
 0x37a   : > { %v1680_v63 = vrot.slane %v1679_v7, 2  ;;  %v1687_v47 = vrot.slane %v1686_v9, 4 }
 0x37b   : > { %v1587_v8 = vpop.permute.xlu0 %1586 }
 0x37c   : > { %v1681_v56 = vmax.f32 %v1679_v7, %v1680_v63  ;;  %v1688_v12 = vmax.f32 %v1686_v9, %v1687_v47  ;;  %v1640_v45 = vsel %vm345_vm1, %v3808_v33, %v1587_v8 }
 0x37d   : > { %v4018_v13 = vadd.f32 %v1640_v45, %v1309_v44  ;;  %v1316_v44 = vld [vmem:[%s3982_s30 + $0x68] sm:$0x3] }
 0x37e   : > { %v1682_v6 = vrot.slane %v1681_v56, 1  ;;  %v1689_v37 = vrot.slane %v1688_v12, 2  ;;  %v1585_v23 = vpop.permute.xlu1 %1584 }
 0x37f   : > { %v1639_v42 = vsel %vm345_vm1, %v3819_v17, %v1585_v23  ;;  %v1702_v38 = vsel %vm769_vm5, %v4018_v13, -inf }
 0x380   : > { %v1683_v59 = vmax.f32 %v1681_v56, %v1682_v6  ;;  %v1690_v0 = vmax.f32 %v1688_v12, %v1689_v37  ;;  %v4009_v34 = vadd.f32 %v1639_v42, %v1308_v20  ;;  %v1313_v56 = vld [vmem:[%s3982_s30 + $0x50] sm:$0xff]  ;;  %v1315_v42 = vld [vmem:[%s3982_s30 + $0x60] sm:$0xff] }
 0x382   : > { %v1765_v53 = vsub.f32 %v1654_v57, %v1683_v59  ;;  %v1766_v4 = vsub.f32 %v1655_v35, %v1683_v59  ;;  %v1691_v55 = vrot.slane %v1690_v0, 1  ;;  %v1694_v31 = vsel %vm1675_vm13, %v4009_v34, -inf }
 0x383   : > { %v1591_v51 = vpop.permute.xlu0 %1590 }
 0x384   : > { %v1785_v43 = vmul.f32 1.442695, %v1765_v53  ;;  %v1787_v3 = vmul.f32 1.442695, %v1766_v4  ;;  %v1692_v10 = vmax.f32 %v1690_v0, %v1691_v55  ;;  %v1642_v30 = vsel %vm345_vm1, %v3837_v25, %v1591_v51 }
 0x386   : > { %3161 = vpow2.f32 %v1785_v43  ;;  %v1767_v57 = vsub.f32 %v1656_v27, %v1692_v10  ;;  %v1768_v26 = vsub.f32 %v1657_v54, %v1692_v10  ;;  %v1589_v17 = vpop.permute.xlu1 %1588  ;;  %v1312_v27 = vld [vmem:[%s3982_s30 + $0x48] sm:$0x3]  ;;  %v1695_v54 = vmax.f32 %v1693_v58, %v1694_v31 }
 0x387   : > { %3163 = vpow2.f32 %v1787_v3  ;;  %v1641_v24 = vsel %vm345_vm1, %v3846_v2, %v1589_v17  ;;  %v1595_v15 = vpop.permute.xlu0 %1594 }
 0x388   : > { %v1789_v35 = vmul.f32 1.442695, %v1767_v57  ;;  %v1791_v18 = vmul.f32 1.442695, %v1768_v26  ;;  %v4016_v33 = vadd.f32 %v1641_v24, %v1310_v50  ;;  %v1644_v12 = vsel %vm345_vm1, %v3855_v16, %v1595_v15 }
 0x389   : > { %v1696_v8 = vrot.slane %v1695_v54, 4  ;;  %v4056_v55 = vadd.f32 %v1644_v12, %v1313_v56 }
 0x38a   : > { %3165 = vpow2.f32 %v1789_v35  ;;  %v1593_v39 = vpop.permute.xlu1 %1592  ;;  %v1703_v2 = vsel %vm1675_vm13, %v4016_v33, -inf }
 0x38b   : > { %3167 = vpow2.f32 %v1791_v18  ;;  %v1643_v60 = vsel %vm345_vm1, %v3869_v41, %v1593_v39  ;;  %v1704_v7 = vmax.f32 %v1702_v38, %v1703_v2  ;;  %v4039_v41 = vadd.f32 %v1642_v30, %v1311_v46  ;;  %v1599_v59 = vpop.permute.xlu0 %1598  ;;  %v1317_v38 = vld [vmem:[%s3982_s30 + $0x70] sm:$0xff] }
 0x38c   : > { %v4034_v9 = vadd.f32 %v1643_v60, %v1312_v27  ;;  %v1646_v43 = vsel %vm345_vm1, %v3879_v48, %v1599_v59  ;;  %v1697_v28 = vmax.f32 %v1695_v54, %v1696_v8  ;;  %v1720_v57 = vsel %vm769_vm5, %v4056_v55, -inf }
 0x38d   : > { %v1705_v23 = vrot.slane %v1704_v7, 4  ;;  %v1711_v20 = vsel %vm769_vm5, %v4039_v41, -inf  ;;  %v4071_v26 = vadd.f32 %v1646_v43, %v1315_v42 }
 0x38e   : > { %v1712_v53 = vsel %vm1675_vm13, %v4034_v9, -inf  ;;  %v1698_v2 = vrot.slane %v1697_v28, 2 }
 0x38f   : > { %v1597_v63 = vpop.permute.xlu1 %1596  ;;  %v1713_v61 = vmax.f32 %v1711_v20, %v1712_v53  ;;  %v1706_v50 = vmax.f32 %v1704_v7, %v1705_v23 }
 0x390   : > { %v4037_v47 = vpop.eup %3161  ;;  %v1645_v6 = vsel %vm345_vm1, %v3893_v36, %v1597_v63  ;;  %v1318_v63 = vld [vmem:[%s3982_s30 + $0x78] sm:$0x3] }
 0x391   : > { %v4046_v37 = vpop.eup %3163  ;;  %v1825_v25 = vsel %vm769_vm5, %v4037_v47, 0.0  ;;  %v4054_v4 = vadd.f32 %v1645_v6, %v1314_v29  ;;  %v1714_v27 = vrot.slane %v1713_v61, 4  ;;  %v1707_v60 = vrot.slane %v1706_v50, 2 }
 0x392   : > { %v1826_v0 = vsel %vm1675_vm13, %v4046_v37, 0.0  ;;  %v1729_v29 = vsel %vm769_vm5, %v4071_v26, -inf  ;;  %v1699_v6 = vmax.f32 %v1697_v28, %v1698_v2 }
 0x393   : > { %v1827_v16 = vadd.f32 %v1826_v0, %v1825_v25  ;;  %v1721_v45 = vsel %vm1675_vm13, %v4054_v4, -inf  ;;  %v1715_v25 = vmax.f32 %v1713_v61, %v1714_v27  ;;  %v1708_v59 = vmax.f32 %v1706_v50, %v1707_v60 }
 0x394   : > { %v4058_v36 = vpop.eup %3165  ;;  %v1722_v35 = vmax.f32 %v1720_v57, %v1721_v45 }
 0x395   : > { %v4065_v3 = vpop.eup %3167  ;;  %v1828_v10 = vrot.slane %v1827_v16, 4  ;;  %v1834_v48 = vsel %vm769_vm5, %v4058_v36, 0.0 }
 0x396   : > { %v1835_v24 = vsel %vm1675_vm13, %v4065_v3, 0.0  ;;  %v1603_v31 = vpop.permute.xlu0 %1602  ;;  %v1723_v7 = vrot.slane %v1722_v35, 4 }
 0x397   : > { %v1829_v51 = vadd.f32 %v1828_v10, %v1827_v16  ;;  %v1601_v17 = vpop.permute.xlu1 %1600  ;;  %v1836_v54 = vadd.f32 %v1835_v24, %v1834_v48  ;;  %v1648_v46 = vsel %vm345_vm1, %v3903_v1, %v1603_v31  ;;  %v1700_v10 = vrot.slane %v1699_v6, 1 }
 0x398   : > { %v1647_v18 = vsel %vm345_vm1, %v3907_v32, %v1601_v17  ;;  %v4092_v0 = vadd.f32 %v1648_v46, %v1317_v38  ;;  %v1724_v42 = vmax.f32 %v1722_v35, %v1723_v7  ;;  %v1320_v17 = vld [vmem:[%s3982_s30 + $0x88] sm:$0x3] }
 0x399   : > { %v1830_v39 = vrot.slane %v1829_v51, 2  ;;  %v4080_v15 = vadd.f32 %v1647_v18, %v1316_v44  ;;  %v1837_v53 = vrot.slane %v1836_v54, 4  ;;  %v1701_v24 = vmax.f32 %v1699_v6, %v1700_v10 }
 0x39a   : > { %v1607_v1 = vpop.permute.xlu0 %1606  ;;  %v1738_v28 = vsel %vm769_vm5, %v4092_v0, -inf  ;;  %v1725_v44 = vrot.slane %v1724_v42, 2 }
 0x39b   : > { %v1831_v58 = vadd.f32 %v1830_v39, %v1829_v51  ;;  %v1605_v30 = vpop.permute.xlu1 %1604  ;;  %v1730_v32 = vsel %vm1675_vm13, %v4080_v15, -inf  ;;  %v1838_v50 = vadd.f32 %v1837_v53, %v1836_v54  ;;  %v1709_v51 = vrot.slane %v1708_v59, 1  ;;  %v1319_v39 = vld [vmem:[%s3982_s30 + $0x80] sm:$0xff] }
 0x39c   : > { %v1649_v56 = vsel %vm345_vm1, %v3919_v5, %v1605_v30  ;;  %v1731_v8 = vmax.f32 %v1729_v29, %v1730_v32  ;;  %v1716_v5 = vrot.slane %v1715_v25, 2  ;;  %v1650_v2 = vsel %vm345_vm1, %v3915_v40, %v1607_v1 }
 0x39d   : > { %v1832_v12 = vrot.slane %v1831_v58, 1  ;;  %v4094_v20 = vadd.f32 %v1649_v56, %v1318_v63  ;;  %v1710_v38 = vmax.f32 %v1708_v59, %v1709_v51  ;;  %v1726_v30 = vmax.f32 %v1724_v42, %v1725_v44 }
 0x39e   : > { %v1732_v16 = vrot.slane %v1731_v8, 4  ;;  %v1611_v48 = vpop.permute.xlu0 %1610  ;;  %v1717_v35 = vmax.f32 %v1715_v25, %v1716_v5  ;;  %v1769_v7 = vsub.f32 %v4014_v21, %v1701_v24  ;;  %v4109_v63 = vadd.f32 %v1650_v2, %v1319_v39 }
 0x39f   : > { %v1833_v23 = vadd.f32 %v1832_v12, %v1831_v58  ;;  %v1609_v43 = vpop.permute.xlu1 %1608  ;;  %v1739_v61 = vsel %vm1675_vm13, %v4094_v20, -inf  ;;  %v1839_v58 = vrot.slane %v1838_v50, 2  ;;  %v1771_v25 = vsub.f32 %v4018_v13, %v1710_v38 }
 0x3a0   : > { %v1733_v45 = vmax.f32 %v1731_v8, %v1732_v16  ;;  %v1740_v57 = vmax.f32 %v1738_v28, %v1739_v61  ;;  %v1651_v27 = vsel %vm345_vm1, %v3931_v22, %v1609_v43  ;;  %v1718_v29 = vrot.slane %v1717_v35, 1 }
 0x3a1   : > { %3169 = vrcp.f32 %v1833_v23  ;;  %v4106_v46 = vadd.f32 %v1651_v27, %v1320_v17  ;;  %v1840_v6 = vadd.f32 %v1839_v58, %v1838_v50  ;;  %v1770_v22 = vsub.f32 %v4009_v34, %v1701_v24  ;;  %v1322_v17 = vld [vmem:[%s3982_s30 + $0x98] sm:$0x3] }
 0x3a2   : > { %v1741_v18 = vrot.slane %v1740_v57, 4  ;;  %v1734_v31 = vrot.slane %v1733_v45, 2  ;;  %v4111_v12 = vpop.permute.xlu0 %991  ;;  %v1727_v1 = vrot.slane %v1726_v30, 1  ;;  %v1793_v16 = vmul.f32 1.442695, %v1769_v7 }
 0x3a3   : > { %v1613_v60 = vpop.permute.xlu1 %1612  ;;  %v1748_v8 = vsel %vm1675_vm13, %v4106_v46, -inf  ;;  %v1719_v42 = vmax.f32 %v1717_v35, %v1718_v29  ;;  %v1747_v34 = vsel %vm769_vm5, %v4109_v63, -inf  ;;  %v1841_v10 = vrot.slane %v1840_v6, 1 }
 0x3a4   : > { %v1742_v54 = vmax.f32 %v1740_v57, %v1741_v18  ;;  %v1735_v56 = vmax.f32 %v1733_v45, %v1734_v31  ;;  %v1749_v43 = vmax.f32 %v1747_v34, %v1748_v8  ;;  %v1795_v5 = vmul.f32 1.442695, %v1770_v22  ;;  %v1321_v45 = vld [vmem:[%s3982_s30 + $0x90] sm:$0xff] }
 0x3a5   : > { %v1797_v28 = vmul.f32 1.442695, %v1771_v25  ;;  %v1728_v61 = vmax.f32 %v1726_v30, %v1727_v1  ;;  %3171 = vpow2.f32 %v1793_v16  ;;  %v1773_v57 = vsub.f32 %v4039_v41, %v1719_v42 }
 0x3a6   : > { %v1743_v32 = vrot.slane %v1742_v54, 2  ;;  %v1736_v13 = vrot.slane %v1735_v56, 1  ;;  %v3041_v51 = vpop.permute.xlu0 %3040  ;;  %v1774_v44 = vsub.f32 %v4034_v9, %v1719_v42  ;;  %v1750_v35 = vrot.slane %v1749_v43, 4 }
 0x3a7   : > { %v4123_v53 = vpop.permute.xlu1 %994  ;;  %v1842_v39 = vadd.f32 %v1841_v10, %v1840_v6  ;;  %3173 = vpow2.f32 %v1795_v5  ;;  %v1775_v2 = vsub.f32 %v4056_v55, %v1728_v61  ;;  %v1801_v9 = vmul.f32 1.442695, %v1773_v57 }
 0x3a8   : > { %v1744_v23 = vmax.f32 %v1742_v54, %v1743_v32  ;;  %v1737_v24 = vmax.f32 %v1735_v56, %v1736_v13  ;;  %3175 = vpow2.f32 %v1797_v28  ;;  %v1803_v58 = vmul.f32 1.442695, %v1774_v44 }
 0x3a9   : > { %v3042_v54 = vunpack.i.l.bf16 %v3041_v51  ;;  %v1751_v7 = vmax.f32 %v1749_v43, %v1750_v35  ;;  %3177 = vrcp.f32 %v1842_v39  ;;  %v4590_v42 = vmov 0.0|0.0   ;;  %v320_v35 = vld [vmem:[%s4552_s4 + $0x8] sm:$0xff] }
 0x3aa   : > { %v1745_v50 = vrot.slane %v1744_v23, 1  ;;  %v1777_v30 = vsub.f32 %v4071_v26, %v1737_v24  ;;  %v4147_v29 = vpop.permute.xlu0 %1945  ;;  %v1778_v55 = vsub.f32 %v4080_v15, %v1737_v24 }
 0x3ab   : > { %v3170_v40 = vpop.eup %3169  ;;  %v3046_v31 = vpop.permute.xlu1 %3045  ;;  %v1752_v15 = vrot.slane %v1751_v7, 2 }
 0x3ac   : > { %v4118_v59 = vmul.f32 %v3170_v40, %v4037_v47  ;;  %v4121_v21 = vmul.f32 %v3170_v40, %v4046_v37  ;;  %v1772_v47 = vsub.f32 %v4016_v33, %v1710_v38  ;;  %v1652_v37 = vsel %vm345_vm1, %v3927_v19, %v1611_v48 }
 0x3ad   : > { %v4134_v18 = vadd.f32 %v1652_v37, %v1321_v45  ;;  %v1653_v33 = vsel %vm345_vm1, %v3946_v62, %v1613_v60  ;;  %v3043_v48 = vunpack.i.h.bf16 %v3041_v51  ;;  %v1746_v27 = vmax.f32 %v1744_v23, %v1745_v50 }
 0x3ae   : > { %v1799_v19 = vmul.f32 1.442695, %v1772_v47  ;;  %v4139_v41 = vadd.f32 %v1653_v33, %v1322_v17  ;;  %v1776_v38 = vsub.f32 %v4054_v4, %v1728_v61  ;;  %v1805_v40 = vmul.f32 1.442695, %v1775_v2  ;;  %v3051_v10 = vpop.permute.xlu0 %3050  ;;  %v322_v33 = vld [vmem:[%s4552_s4 + $0x18] sm:$0xff] }
 0x3af   : > { %v1756_v62 = vsel %vm769_vm5, %v4134_v18, -inf  ;;  %v4150_v56 = vpack.c.bf16 %v3043_v48, %v3042_v54  ;;  %v1779_v4 = vsub.f32 %v4092_v0, %v1746_v27  ;;  %v3048_v6 = vunpack.i.h.bf16 %v3046_v31  ;;  %v4153_v22 = vpop.permute.xlu1 %1947  ;;  %v4160_v34 = vpop.eup %3171 }
 0x3b0   : > { %v1757_v60 = vsel %vm1675_vm13, %v4139_v41, -inf  ;;  %v3047_v26 = vunpack.i.l.bf16 %v3046_v31  ;;  %3179 = vpow2.f32 %v1799_v19  ;;  %v1807_v25 = vmul.f32 1.442695, %v1776_v38  ;;  %v326_v38 = vld [vmem:[%s4552_s4 + $0x38] sm:$0xff] }
 0x3b1   : > { %v1758_v32 = vmax.f32 %v1756_v62, %v1757_v60  ;;  %v1780_v8 = vsub.f32 %v4094_v20, %v1746_v27  ;;  %2904 = vmatpush3.bf16.msra.mxu1 %v4150_v56  ;;  %3181 = vpow2.f32 %v1801_v9  ;;  %v1809_v23 = vmul.f32 1.442695, %v1777_v30  ;;  %v4162_v5 = vpop.eup %3173 }
 0x3b2   : > { %v4157_v16 = vpack.c.bf16 %v3048_v6, %v3047_v26  ;;  %2905 = vmatprep.subr.bf16.mxu1 %v4590_v42  ;;  %3183 = vpow2.f32 %v1803_v58  ;;  %v1811_v0 = vmul.f32 1.442695, %v1778_v55  ;;  %v1813_v13 = vmul.f32 1.442695, %v1779_v4  ;;  %v4165_v45 = vpop.eup %3175  ;;  %v324_v58 = vld [vmem:[%s4552_s4 + $0x28] sm:$0xff] }
 0x3b3   : > { %v1759_v1 = vrot.slane %v1758_v32, 4  ;;  %3185 = vpow2.f32 %v1805_v40  ;;  %v1815_v20 = vmul.f32 1.442695, %v1780_v8  ;;  %v3053_v47 = vunpack.i.h.bf16 %v3051_v10  ;;  %v3056_v50 = vpop.permute.xlu1 %3055  ;;  %v3178_v24 = vpop.eup %3177  ;;  %v330_v8 = vld [vmem:[%s4552_s4 + $0x58] sm:$0xff] }
 0x3b4   : > { %3187 = vpow2.f32 %v1807_v25  ;;  %v1753_v37 = vmax.f32 %v1751_v7, %v1752_v15  ;;  %v3052_v61 = vunpack.i.l.bf16 %v3051_v10  ;;  %v3058_v51 = vunpack.i.h.bf16 %v3056_v50  ;;  %v328_v25 = vld [vmem:[%s4552_s4 + $0x48] sm:$0xff] }
 0x3b5   : > { %v1760_v43 = vmax.f32 %v1758_v32, %v1759_v1  ;;  %2907 = vmatpush3.bf16.msra.mxu1 %v4157_v16  ;;  %3189 = vpow2.f32 %v1809_v23  ;;  %v3057_v57 = vunpack.i.l.bf16 %v3056_v50  ;;  %v4181_v48 = vsel %vm345_vm1, %v4111_v12, %v4123_v53  ;;  %v4591_v1 = vld [vmem:[#allocation5_spill] sm:$0xff]  ;;  %v332_v50 = vld [vmem:[%s4552_s4 + $0x68] sm:$0xff] }
 0x3b6   : > { %2908 = vmatprep.subr.bf16.mxu1 %v4590_v42  ;;  %3191 = vpow2.f32 %v1811_v0  ;;  %v4168_v17 = vpack.c.bf16 %v3053_v47, %v3052_v61  ;;  %v1754_v31 = vrot.slane %v1753_v37, 1  ;;  %v1843_v27 = vsel %vm769_vm5, %v4160_v34, 0.0 }
 0x3b7   : > { %v1761_v28 = vrot.slane %v1760_v43, 2  ;;  %3193 = vpow2.f32 %v1813_v13  ;;  %v4176_v19 = vpack.c.bf16 %v3058_v51, %v3057_v57  ;;  %v1844_v9 = vsel %vm1675_vm13, %v4162_v5, 0.0 }
 0x3b8   : > { %3195 = vpow2.f32 %v1815_v20  ;;  %v4199_v54 = vpack.c.bf16 %v322_v33, %v320_v35  ;;  %v1927_v7 = vmul.f32 %v3178_v24, %v4058_v36  ;;  %v1928_v62 = vmul.f32 %v3178_v24, %v4065_v3 }
 0x3b9   : > { %v1762_v44 = vmax.f32 %v1760_v43, %v1761_v28  ;;  %2910 = vmatpush3.bf16.msra.mxu1 %v4168_v17  ;;  %v4207_v55 = vadd.f32 %v1844_v9, %v1843_v27  ;;  %v1755_v32 = vmax.f32 %v1753_v37, %v1754_v31  ;;  %v4210_v40 = vpack.c.bf16 %v326_v38, %v324_v58 }
 0x3ba   : > { %v4184_v2 = vpop.eup %3179  ;;  %2911 = vmatprep.subr.bf16.mxu1 %v4590_v42  ;;  %2916 = vmatpush3.bf16.msra.mxu0 %v4199_v54  ;;  %v1852_v6 = vsel %vm769_vm5, %v4165_v45, 0.0  ;;  %v4224_v26 = vsel %vm345_vm1, %v3367_v49, %v4147_v29  ;;  %v4242_v29 = vsel %vm345_vm1, %v3373_v52, %v4153_v22 }
 0x3bb   : > { %v1763_v39 = vrot.slane %v1762_v44, 1  ;;  %v4197_v12 = vpop.eup %3181  ;;  %v1853_v36 = vsel %vm1675_vm13, %v4184_v2, 0.0  ;;  %2917 = vmatprep.subr.bf16.mxu0 %v4590_v42  ;;  %v1953_v0 = vmul.f32 %v4224_v26, %v4118_v59  ;;  %v1954_v10 = vmul.f32 %v4242_v29, %v4121_v21 }
 0x3bc   : > { %v4201_v30 = vpop.eup %3183  ;;  %v1861_v3 = vsel %vm769_vm5, %v4197_v12, 0.0  ;;  %v1955_v20 = vmul.f32 %v4224_v26, %v1927_v7  ;;  %v1956_v47 = vmul.f32 %v4242_v29, %v1928_v62  ;;  %v1846_v37 = vrot.slane %v4207_v55, 4 }
 0x3bd   : > { %v1764_v53 = vmax.f32 %v1762_v44, %v1763_v39  ;;  %v4205_v60 = vpop.eup %3185  ;;  %2913 = vmatpush3.bf16.msra.mxu1 %v4176_v19  ;;  %v1862_v15 = vsel %vm1675_vm13, %v4201_v30, 0.0  ;;  %v1781_v52 = vsub.f32 %v4109_v63, %v1755_v32  ;;  %v4258_v59 = vpack.c.bf16 %v330_v8, %v328_v25  ;;  %v334_v63 = vld [vmem:[%s4552_s4 + $0x78] sm:$0xff] }
 0x3be   : > { %v4213_v4 = vpop.eup %3187  ;;  %2927 = vmatprep.subr.bf16.mxu1 %v4591_v1  ;;  %2919 = vmatpush3.bf16.msra.mxu0 %v4210_v40  ;;  %v1863_v28 = vadd.f32 %v1862_v15, %v1861_v3  ;;  %v1870_v21 = vsel %vm769_vm5, %v4205_v60, 0.0  ;;  %v1782_v61 = vsub.f32 %v4106_v46, %v1755_v32  ;;  %v1973_v24 = vsel %vm769_vm5, %v1953_v0, 0.0 }
 0x3bf   : > { %v4234_v23 = vpop.eup %3189  ;;  %v1783_v49 = vsub.f32 %v4134_v18, %v1764_v53  ;;  %v1784_v43 = vsub.f32 %v4139_v41, %v1764_v53  ;;  %v1854_v41 = vadd.f32 %v1853_v36, %v1852_v6  ;;  %2920 = vmatprep.subr.bf16.mxu0 %v4590_v42  ;;  %v1871_v51 = vsel %vm1675_vm13, %v4213_v4, 0.0 }
 0x3c0   : > { %v4246_v13 = vpop.eup %3191  ;;  %v1879_v57 = vsel %vm769_vm5, %v4234_v23, 0.0  ;;  %v1974_v35 = vsel %vm1675_vm13, %v1954_v10, 0.0  ;;  %v1982_v33 = vsel %vm769_vm5, %v1955_v20, 0.0  ;;  %v1983_v31 = vsel %vm1675_vm13, %v1956_v47, 0.0 }
 0x3c1   : > { %v4253_v18 = vpop.eup %3193  ;;  %v1821_v44 = vmul.f32 1.442695, %v1783_v49  ;;  %v1823_v46 = vmul.f32 1.442695, %v1784_v43  ;;  %v1880_v39 = vsel %vm1675_vm13, %v4246_v13, 0.0  ;;  %v4283_v9 = vpack.c.bf16 %v334_v63, %v332_v50 }
 0x3c2   : > { %v4260_v22 = vpop.eup %3195  ;;  %v1817_v27 = vmul.f32 1.442695, %v1781_v52  ;;  %2922 = vmatpush3.bf16.msra.mxu0 %v4258_v59  ;;  %v1975_v58 = vadd.f32 %v1974_v35, %v1973_v24  ;;  %v1888_v38 = vsel %vm769_vm5, %v4253_v18, 0.0  ;;  %v1819_v7 = vmul.f32 1.442695, %v1782_v61 }
 0x3c3   : > { %v1889_v53 = vsel %vm1675_vm13, %v4260_v22, 0.0  ;;  %2923 = vmatprep.subr.bf16.mxu0 %v4590_v42  ;;  %v1984_v62 = vadd.f32 %v1983_v31, %v1982_v33  ;;  %v1855_v32 = vrot.slane %v1854_v41, 4  ;;  %v1872_v6 = vadd.f32 %v1871_v51, %v1870_v21 }
 0x3c4   : > { %3197 = vpow2.f32 %v1821_v44  ;;  %v1976_v36 = vrot.slane %v1975_v58, 4  ;;  %v1881_v3 = vadd.f32 %v1880_v39, %v1879_v57  ;;  %v1890_v8 = vadd.f32 %v1889_v53, %v1888_v38 }
 0x3c5   : > { %3199 = vpow2.f32 %v1823_v46  ;;  %v1985_v25 = vrot.slane %v1984_v62, 4  ;;  %v1847_v49 = vadd.f32 %v1846_v37, %v4207_v55  ;;  %v1864_v0 = vrot.slane %v1863_v28, 4 }
 0x3c6   : > { %3201 = vpow2.f32 %v1817_v27  ;;  %2925 = vmatpush3.bf16.msra.mxu0 %v4283_v9  ;;  %v1977_v15 = vadd.f32 %v1976_v36, %v1975_v58  ;;  %v1856_v43 = vadd.f32 %v1855_v32, %v1854_v41  ;;  %v1873_v10 = vrot.slane %v1872_v6, 4 }
 0x3c7   : > { %3203 = vpow2.f32 %v1819_v7  ;;  %2943 = vmatprep.subr.bf16.mxu0 %v4150_v56  ;;  %v1986_v42 = vadd.f32 %v1985_v25, %v1984_v62  ;;  %v1882_v47 = vrot.slane %v1881_v3, 4  ;;  %v1891_v21 = vrot.slane %v1890_v8, 4  ;;  %v4592_v7 = vld [vmem:[#allocation3_spill] sm:$0xff] }
 0x3c8   : > { %v1978_v20 = vrot.slane %v1977_v15, 2  ;;  %v1848_v61 = vrot.slane %v1847_v49, 2  ;;  %v1865_v50 = vadd.f32 %v1864_v0, %v1863_v28  ;;  %v1857_v57 = vrot.slane %v1856_v43, 2 }
 0x3c9   : > { %v1987_v52 = vrot.slane %v1986_v42, 2  ;;  %v1874_v44 = vadd.f32 %v1873_v10, %v1872_v6  ;;  %v1883_v24 = vadd.f32 %v1882_v47, %v1881_v3  ;;  %v1892_v37 = vadd.f32 %v1891_v21, %v1890_v8  ;;  %v3239_v47 = vld [vmem:[%s4554_s6] sm:$0x7] }
 0x3ca   : > { %v1979_v63 = vadd.f32 %v1978_v20, %v1977_v15  ;;  %v1849_v33 = vadd.f32 %v1848_v61, %v1847_v49  ;;  %v1866_v41 = vrot.slane %v1865_v50, 2  ;;  %v1858_v27 = vadd.f32 %v1857_v57, %v1856_v43 }
 0x3cb   : > { %v1988_v51 = vadd.f32 %v1987_v52, %v1986_v42  ;;  %v1875_v58 = vrot.slane %v1874_v44, 2  ;;  %v1884_v28 = vrot.slane %v1883_v24, 2  ;;  %v1105_v62 = vsub.s32 1, %v4592_v7 }
 0x3cc   : > { %v1980_v31 = vrot.slane %v1979_v63, 1  ;;  %v1893_v32 = vrot.slane %v1892_v37, 2  ;;  %v1850_v3 = vrot.slane %v1849_v33, 1  ;;  %v1867_v25 = vadd.f32 %v1866_v41, %v1865_v50 }
 0x3cd   : > { %v1989_v46 = vrot.slane %v1988_v51, 1  ;;  %v1859_v15 = vrot.slane %v1858_v27, 1  ;;  %v1876_v49 = vadd.f32 %v1875_v58, %v1874_v44  ;;  %v1885_v43 = vadd.f32 %v1884_v28, %v1883_v24 }
 0x3ce   : > { %v4293_v55 = vpop.eup %3197  ;;  %v1981_v8 = vadd.f32 %v1980_v31, %v1979_v63  ;;  %v4316_v52 = vrot.slane %v3239_v47, %v1105_v62  ;;  %v1894_v21 = vadd.f32 %v1893_v32, %v1892_v37  ;;  %v1868_v61 = vrot.slane %v1867_v25, 1  ;;  %v4593_v62 = vld [vmem:[#allocation2_spill] sm:$0xff] }
 0x3cf   : > { %v4295_v35 = vpop.eup %3199  ;;  %v1990_v53 = vadd.f32 %v1989_v46, %v1988_v51  ;;  %v1906_v6 = vsel %vm769_vm5, %v4293_v55, 0.0  ;;  %v1851_v63 = vadd.f32 %v1850_v3, %v1849_v33  ;;  %v1877_v51 = vrot.slane %v1876_v49, 1 }
 0x3d0   : > { %v4297_v39 = vpop.eup %3201  ;;  %v1907_v36 = vsel %vm1675_vm13, %v4295_v35, 0.0  ;;  %1219 = vrot.lane.b32.xlu0 %v4316_v52, %s3253_s19  ;;  %v1860_v57 = vadd.f32 %v1859_v15, %v1858_v27  ;;  %v1886_v44 = vrot.slane %v1885_v43, 1  ;;  %v1895_v46 = vrot.slane %v1894_v21, 1 }
 0x3d1   : > { %v4299_v38 = vpop.eup %3203  ;;  %v1897_v0 = vsel %vm769_vm5, %v4297_v39, 0.0  ;;  %v1908_v10 = vadd.f32 %v1907_v36, %v1906_v6  ;;  %v4311_v20 = vsel %vm1006_vm6, %v1990_v53, %v1981_v8  ;;  %v1869_v41 = vadd.f32 %v1868_v61, %v1867_v25 }
 0x3d2   : > { %v1898_v42 = vsel %vm1675_vm13, %v4299_v38, 0.0  ;;  %3205 = vrcp.f32 %v1851_v63  ;;  %v1878_v58 = vadd.f32 %v1877_v51, %v1876_v49  ;;  %v1887_v28 = vadd.f32 %v1886_v44, %v1885_v43 }
 0x3d3   : > { %v1899_v50 = vadd.f32 %v1898_v42, %v1897_v0  ;;  %v1909_v24 = vrot.slane %v1908_v10, 4  ;;  %3207 = vrcp.f32 %v1860_v57  ;;  %v1896_v53 = vadd.f32 %v1895_v46, %v1894_v21 }
 0x3d4   : > { %2427 = vrot.lane.b32.xlu0 %v3239_v47, %s3255_s22  ;;  %3209 = vrcp.f32 %v1869_v41 }
 0x3d5   : > { %v1900_v31 = vrot.slane %v1899_v50, 4  ;;  %v1910_v37 = vadd.f32 %v1909_v24, %v1908_v10  ;;  %3211 = vrcp.f32 %v1878_v58 }
 0x3d6   : > { %3213 = vrcp.f32 %v1887_v28 }
 0x3d7   : > { %v1901_v7 = vadd.f32 %v1900_v31, %v1899_v50  ;;  %v1911_v33 = vrot.slane %v1910_v37, 2  ;;  %3215 = vrcp.f32 %v1896_v53 }
 0x3d8   : > { %2507 = vrot.lane.b32.xlu0 %v4593_v62, %s3251_s11 }
 0x3d9   : > { %v1902_v27 = vrot.slane %v1901_v7, 2  ;;  %v1912_v32 = vadd.f32 %v1911_v33, %v1910_v37 }
 0x3db   : > { %v1903_v3 = vadd.f32 %v1902_v27, %v1901_v7  ;;  %v1913_v15 = vrot.slane %v1912_v32, 1 }
 0x3dc   : > { %v3206_v6 = vpop.eup %3205 }
 0x3dd   : > { %v3208_v36 = vpop.eup %3207  ;;  %v1929_v8 = vmul.f32 %v3206_v6, %v4160_v34  ;;  %v1930_v0 = vmul.f32 %v3206_v6, %v4162_v5  ;;  %v1904_v47 = vrot.slane %v1903_v3, 1  ;;  %v1914_v34 = vadd.f32 %v1913_v15, %v1912_v32 }
 0x3de   : > { %v3210_v25 = vpop.eup %3209  ;;  %v1931_v42 = vmul.f32 %v3208_v36, %v4165_v45  ;;  %v1932_v10 = vmul.f32 %v3208_v36, %v4184_v2 }
 0x3df   : > { %v3212_v49 = vpop.eup %3211  ;;  %v1933_v61 = vmul.f32 %v3210_v25, %v4197_v12  ;;  %v1934_v50 = vmul.f32 %v3210_v25, %v4201_v30  ;;  %v1957_v57 = vmul.f32 %v4224_v26, %v1929_v8  ;;  %v1958_v44 = vmul.f32 %v4242_v29, %v1930_v0 }
 0x3e0   : > { %v3214_v43 = vpop.eup %3213  ;;  %v1935_v63 = vmul.f32 %v3212_v49, %v4205_v60  ;;  %v1936_v51 = vmul.f32 %v3212_v49, %v4213_v4  ;;  %v1959_v2 = vmul.f32 %v4224_v26, %v1931_v42  ;;  %v1905_v12 = vadd.f32 %v1904_v47, %v1903_v3 }
 0x3e1   : > { %v3216_v21 = vpop.eup %3215  ;;  %v1937_v5 = vmul.f32 %v3214_v43, %v4234_v23  ;;  %v1938_v45 = vmul.f32 %v3214_v43, %v4246_v13  ;;  %v1960_v60 = vmul.f32 %v4242_v29, %v1932_v10  ;;  %v1961_v4 = vmul.f32 %v4224_v26, %v1933_v61 }
 0x3e2   : > { %v1940_v24 = vmul.f32 %v3216_v21, %v4260_v22  ;;  %v1939_v30 = vmul.f32 %v3216_v21, %v4253_v18  ;;  %v1962_v46 = vmul.f32 %v4242_v29, %v1934_v50  ;;  %3217 = vrcp.f32 %v1914_v34 }
 0x3e3   : > { %v1963_v23 = vmul.f32 %v4224_v26, %v1935_v63  ;;  %v1964_v13 = vmul.f32 %v4242_v29, %v1936_v51  ;;  %v1991_v41 = vsel %vm769_vm5, %v1957_v57, 0.0  ;;  %v1965_v31 = vmul.f32 %v4224_v26, %v1937_v5 }
 0x3e4   : > { %v1966_v22 = vmul.f32 %v4242_v29, %v1938_v45  ;;  %v1992_v58 = vsel %vm1675_vm13, %v1958_v44, 0.0  ;;  %v2000_v18 = vsel %vm769_vm5, %v1959_v2, 0.0  ;;  %3219 = vrcp.f32 %v1905_v12 }
 0x3e5   : > { %v1967_v37 = vmul.f32 %v4224_v26, %v1939_v30  ;;  %v1968_v53 = vmul.f32 %v4242_v29, %v1940_v24  ;;  %v2001_v7 = vsel %vm1675_vm13, %v1960_v60, 0.0  ;;  %v2009_v32 = vsel %vm769_vm5, %v1961_v4, 0.0 }
 0x3e6   : > { %v2010_v6 = vsel %vm1675_vm13, %v1962_v46, 0.0  ;;  %v1993_v36 = vadd.f32 %v1992_v58, %v1991_v41  ;;  %v2018_v3 = vsel %vm769_vm5, %v1963_v23, 0.0  ;;  %v2019_v25 = vsel %vm1675_vm13, %v1964_v13, 0.0 }
 0x3e7   : > { %v2002_v15 = vadd.f32 %v2001_v7, %v2000_v18  ;;  %v2027_v49 = vsel %vm769_vm5, %v1965_v31, 0.0  ;;  %v2028_v0 = vsel %vm1675_vm13, %v1966_v22, 0.0  ;;  %v2011_v42 = vadd.f32 %v2010_v6, %v2009_v32 }
 0x3e8   : > { %v2036_v43 = vsel %vm769_vm5, %v1967_v37, 0.0  ;;  %v2020_v10 = vadd.f32 %v2019_v25, %v2018_v3  ;;  %v1994_v47 = vrot.slane %v1993_v36, 4  ;;  %v2029_v21 = vadd.f32 %v2028_v0, %v2027_v49 }
 0x3e9   : > { %v2003_v61 = vrot.slane %v2002_v15, 4  ;;  %v2012_v51 = vrot.slane %v2011_v42, 4 }
 0x3ea   : > { %v2021_v34 = vrot.slane %v2020_v10, 4  ;;  %v1995_v5 = vadd.f32 %v1994_v47, %v1993_v36  ;;  %v2030_v45 = vrot.slane %v2029_v21, 4 }
 0x3eb   : > { %v2004_v24 = vadd.f32 %v2003_v61, %v2002_v15  ;;  %v2013_v30 = vadd.f32 %v2012_v51, %v2011_v42 }
 0x3ec   : > { %v3218_v63 = vpop.eup %3217  ;;  %v2022_v46 = vadd.f32 %v2021_v34, %v2020_v10  ;;  %v1996_v23 = vrot.slane %v1995_v5, 2  ;;  %v2031_v13 = vadd.f32 %v2030_v45, %v2029_v21 }
 0x3ed   : > { %v1943_v44 = vmul.f32 %v3218_v63, %v4293_v55  ;;  %v1944_v2 = vmul.f32 %v3218_v63, %v4295_v35  ;;  %v2005_v31 = vrot.slane %v2004_v24, 2 }
 0x3ee   : > { %v3220_v57 = vpop.eup %3219  ;;  %v2023_v35 = vrot.slane %v2022_v46, 2 }
 0x3ef   : > { %v1941_v60 = vmul.f32 %v3220_v57, %v4297_v39  ;;  %v1942_v4 = vmul.f32 %v3220_v57, %v4299_v38  ;;  %v1971_v58 = vmul.f32 %v4224_v26, %v1943_v44  ;;  %v1972_v18 = vmul.f32 %v4242_v29, %v1944_v2 }
 0x3f0   : > { %v1997_v39 = vadd.f32 %v1996_v23, %v1995_v5  ;;  %v2032_v38 = vrot.slane %v2031_v13, 2  ;;  %v2006_v7 = vadd.f32 %v2005_v31, %v2004_v24  ;;  %v2024_v36 = vadd.f32 %v2023_v35, %v2022_v46 }
 0x3f1   : > { %v1969_v37 = vmul.f32 %v4224_v26, %v1941_v60  ;;  %v2055_v32 = vsel %vm1675_vm13, %v1972_v18, 0.0 }
 0x3f2   : > { %v2033_v15 = vadd.f32 %v2032_v38, %v2031_v13  ;;  %v2007_v0 = vrot.slane %v2006_v7, 1  ;;  %v2025_v10 = vrot.slane %v2024_v36, 1 }
 0x3f3   : > { %v2045_v3 = vsel %vm769_vm5, %v1969_v37, 0.0  ;;  %v4596_v37 = vld [vmem:[#allocation9_spill] sm:$0xff] }
 0x3f4   : > { %v2034_v21 = vrot.slane %v2033_v15, 1  ;;  %v2026_v45 = vadd.f32 %v2025_v10, %v2024_v36 }
 0x3f6   : > { %v2035_v44 = vadd.f32 %v2034_v21, %v2033_v15 }
 0x3ff   : > { %v1088_v28 = vpop.f32.mrb[6].mxu1 }
 0x400   : > { %v1089_v33 = vadd.f32 %v1088_v28, %v4181_v48  ;;  %v2782_v27 = vpop.f32.mrb[7].mxu1  ;;  %v2037_v48 = vsel %vm1675_vm13, %v1968_v53, 0.0  ;;  %v2014_v28 = vrot.slane %v2013_v30, 2  ;;  %v1970_v53 = vmul.f32 %v4242_v29, %v1942_v4 }
 0x401   : > { %v2038_v50 = vadd.f32 %v2037_v48, %v2036_v43  ;;  %v2054_v27 = vsel %vm769_vm5, %v1971_v58, 0.0 }
 0x402   : > { %v2607_v8 = vmul.f32 -1.442695, %v1089_v33  ;;  %v2015_v6 = vadd.f32 %v2014_v28, %v2013_v30  ;;  %v2046_v25 = vsel %vm1675_vm13, %v1970_v53, 0.0  ;;  %v2056_v49 = vadd.f32 %v2055_v32, %v2054_v27 }
 0x403   : > { %v2039_v12 = vrot.slane %v2038_v50, 4  ;;  %v2047_v48 = vadd.f32 %v2046_v25, %v2045_v3 }
 0x404   : > { %3221 = vpow2.f32 %v2607_v8  ;;  %v1998_v8 = vrot.slane %v1997_v39, 1  ;;  %v2016_v43 = vrot.slane %v2015_v6, 1  ;;  %v2057_v61 = vrot.slane %v2056_v49, 4 }
 0x405   : > { %v2040_v22 = vadd.f32 %v2039_v12, %v2038_v50  ;;  %v2008_v50 = vadd.f32 %v2007_v0, %v2006_v7  ;;  %v2048_v57 = vrot.slane %v2047_v48, 4 }
 0x406   : > { %v1999_v47 = vadd.f32 %v1998_v8, %v1997_v39  ;;  %v2017_v34 = vadd.f32 %v2016_v43, %v2015_v6  ;;  %v2058_v24 = vadd.f32 %v2057_v61, %v2056_v49  ;;  %v2072_v6 = vpop.permute.xlu1 %2071 }
 0x407   : > { %v2041_v33 = vrot.slane %v2040_v22, 2  ;;  %v2049_v23 = vadd.f32 %v2048_v57, %v2047_v48 }
 0x408   : > { %v2090_v2 = vsel %vm1008_vm7, %v1999_v47, %v4311_v20  ;;  %v4594_v20 = vld [vmem:[#allocation6_spill] sm:$0xff] }
 0x409   : > { %v2042_v42 = vadd.f32 %v2041_v33, %v2040_v22  ;;  %v2091_v4 = vsel %vm1010_vm8, %v2008_v50, %v2090_v2  ;;  %v2059_v22 = vrot.slane %v2058_v24, 2 }
 0x40a   : > { %v2092_v46 = vsel %vm1012_vm9, %v2017_v34, %v2091_v4  ;;  %v2074_v36 = vpop.permute.xlu1 %2073 }
 0x40b   : > { %v2043_v63 = vrot.slane %v2042_v42, 1  ;;  %v2060_v58 = vadd.f32 %v2059_v22, %v2058_v24 }
 0x40d   : > { %v2044_v60 = vadd.f32 %v2043_v63, %v2042_v42  ;;  %v2061_v28 = vrot.slane %v2060_v58, 1 }
 0x40e   : > { %v3222_v41 = vpop.eup %3221 }
 0x40f   : > { %v1095_v55 = vadd.f32 1.0, %v3222_v41  ;;  %v2093_v41 = vsel %vm1014_vm10, %v2026_v45, %v2092_v46  ;;  %v2062_v53 = vadd.f32 %v2061_v28, %v2060_v58  ;;  %v2414_v28 = vld [vmem:[%s4553_s5 + $0x98] sm:$0xff] }
 0x410   : > { %v2094_v31 = vsel %vm1016_vm11, %v2035_v44, %v2093_v41 }
 0x411   : > { %3223 = vrcp.f32 %v1095_v55  ;;  %v4595_v55 = vld [vmem:[#allocation7_spill] sm:$0xff] }
 0x41b   : > { %v3224_v51 = vpop.eup %3223 }
 0x41c   : > { %v1099_v5 = vsub.f32 1.0, %v3224_v51  ;;  %v1098_v12 = vmul.f32 %v3224_v51, %v3693_v14  ;;  %v4385_v14 = vsel %vm1018_vm12, %v2044_v60, %v2094_v31 }
 0x41e   : > { %v1101_v30 = vmul.f32 %v1099_v5, %v3934_v11  ;;  %v2050_v11 = vrot.slane %v2049_v23, 2 }
 0x420   : > { %v4378_v13 = vadd.f32 %v1101_v30, %v1098_v12  ;;  %v2051_v18 = vadd.f32 %v2050_v11, %v2049_v23  ;;  %v2412_v11 = vld [vmem:[%s4553_s5 + $0x88] sm:$0xff] }
 0x422   : > { %2800 = vmatmul.mubr.msk.f32.vlgmr.msra.gmra.mrb[8].mxu1 %vm769_vm5, %v4378_v13  ;;  %v2052_v35 = vrot.slane %v2051_v18, 1 }
 0x423   : > { %2929 = vmatpush3.bf16.msra.mxu1 %v4591_v1  ;;  %2837 = vmatprep.mubr.msk.f32.mxu1 %vm769_vm5, %v4385_v14 }
 0x424   : > { %2931 = vmatprep.subr.bf16.mxu1 %v4594_v20  ;;  %v2053_v1 = vadd.f32 %v2052_v35, %v2051_v18  ;;  %v2396_v18 = vld [vmem:[%s4553_s5 + $0x8] sm:$0xff] }
 0x426   : > { %v2096_v39 = vsel %vm1006_vm6, %v2062_v53, %v2053_v1  ;;  %v2397_v53 = vld [vmem:[%s4553_s5 + $0x10] sm:$0xff]  ;;  %v2398_v1 = vld [vmem:[%s4553_s5 + $0x18] sm:$0xff] }
 0x427   : > { %2933 = vmatpush3.bf16.msra.mxu1 %v4594_v20  ;;  %v2395_v20 = vld [vmem:[%s4553_s5] sm:$0xff] }
 0x428   : > { %2935 = vmatprep.subr.bf16.mxu1 %v4595_v55  ;;  %v2976_v35 = vpack.c.bf16 %v2396_v18, %v2395_v20 }
 0x42b   : > { %2937 = vmatpush3.bf16.msra.mxu1 %v4595_v55  ;;  %v2413_v55 = vld [vmem:[%s4553_s5 + $0x90] sm:$0xff] }
 0x42c   : > { %2939 = vmatprep.subr.bf16.mxu1 %v4596_v37 }
 0x42f   : > { %2941 = vmatpush3.bf16.msra.mxu1 %v4596_v37  ;;  %v2978_v37 = vpack.c.bf16 %v2414_v28, %v2413_v55 }
 0x430   : > { %2959 = vmatprep.subr.bf16.mxu1 %v4199_v54 }
 0x432   : > { %2838 = vmatmul.mubr.msk.f32.vlgmr.msra.gmra.mrb[10].mxu1 %vm769_vm5, %v2096_v39 }
 0x433   : > { %2961 = vmatpush3.bf16.msra.mxu1 %v4199_v54  ;;  %v2066_v54 = vpop.permute.xlu0 %2065 }
 0x434   : > { %2963 = vmatprep.subr.bf16.mxu1 %v4210_v40  ;;  %v2077_v15 = vsel %vm345_vm1, %v2066_v54, %v2072_v6  ;;  %v2417_v6 = vld [vmem:[%s4553_s5 + $0xb0] sm:$0xff]  ;;  %v2418_v54 = vld [vmem:[%s4553_s5 + $0xb8] sm:$0xff] }
 0x437   : > { %2965 = vmatpush3.bf16.msra.mxu1 %v4210_v40  ;;  %v2068_v3 = vpop.permute.xlu0 %2067 }
 0x438   : > { %2967 = vmatprep.subr.bf16.mxu1 %v4258_v59  ;;  %v2078_v40 = vsel %vm345_vm1, %v2068_v3, %v2074_v36  ;;  %v2986_v3 = vpack.c.bf16 %v2418_v54, %v2417_v6  ;;  %vm2503_vm1 = vcmask 253952  }
 0x43b   : > { %2969 = vmatpush3.bf16.msra.mxu1 %v4258_v59 }
 0x43c   : > { %2971 = vmatprep.subr.bf16.mxu1 %v4283_v9 }
 0x43f   : > { %2973 = vmatpush3.bf16.msra.mxu1 %v4283_v9 }
 0x4f5   : > { %v1208_v38 = vpop.f32.mrb[8].mxu1 }
 0x4f6   : > { %v1209_v7 = vadd.f32 %v1208_v38, %v4316_v52  ;;  %v2801_v33 = vpop.f32.mrb[9].mxu1  ;;  %v2416_v38 = vld [vmem:[%s4553_s5 + $0xa8] sm:$0xff] }
 0x4f8   : > { %v1213_v27 = vmin.f32 %v1209_v7, 0.0  ;;  %vm1212_vm14 = vcmp.gt.f32.partialorder %v1209_v7, 0.0 }
 0x4fa   : > { %v1214_v32 = vmul.f32 1.442695, %v1213_v27  ;;  %v2399_v27 = vld [vmem:[%s4553_s5 + $0x20] sm:$0xff] }
 0x4fc   : > { %3225 = vpow2.f32 %v1214_v32  ;;  %v2400_v32 = vld [vmem:[%s4553_s5 + $0x28] sm:$0xff] }
 0x4fd   : > { %v2984_v36 = vpack.c.bf16 %v2400_v32, %v2399_v27 }
 0x505   : > { %v2839_v25 = vpop.f32.mrb[10].mxu1 }
 0x506   : > { %v3226_v8 = vpop.eup %3225  ;;  %v2173_v59 = vadd.f32 %v2839_v25, %v2078_v40  ;;  %v2167_v49 = vpop.f32.mrb[11].mxu1  ;;  %v2401_v40 = vld [vmem:[%s4553_s5 + $0x30] sm:$0xff]  ;;  %v2402_v25 = vld [vmem:[%s4553_s5 + $0x38] sm:$0xff] }
 0x507   : > { %v2609_v9 = vadd.f32 -1.0, %v3226_v8  ;;  %v2168_v0 = vadd.f32 %v2167_v49, %v2077_v15  ;;  %v2419_v8 = vld [vmem:[%s4553_s5 + $0xc0] sm:$0xff]  ;;  %v2988_v15 = vpack.c.bf16 %v2402_v25, %v2401_v40 }
 0x508   : > { %v2614_v42 = vmul.f32 -1.442695, %v2173_v59  ;;  %v2420_v59 = vld [vmem:[%s4553_s5 + $0xc8] sm:$0xff] }
 0x509   : > { %v1217_v43 = vsel %vm1212_vm14, %v1209_v7, %v2609_v9  ;;  %v2613_v48 = vmul.f32 -1.442695, %v2168_v0  ;;  %v2980_v7 = vpack.c.bf16 %v2398_v1, %v2397_v53  ;;  %v2990_v49 = vpack.c.bf16 %v2420_v59, %v2419_v8  ;;  %v2403_v9 = vld [vmem:[%s4553_s5 + $0x40] sm:$0xff]  ;;  %v2404_v0 = vld [vmem:[%s4553_s5 + $0x48] sm:$0xff] }
 0x50a   : > { %3227 = vpow2.f32 %v2614_v42  ;;  %2819 = vmatmul.mubr.msk.f32.vlgmr.msra.gmra.mrb[6].mxu0 %vm769_vm5, %v1217_v43  ;;  %v2421_v42 = vld [vmem:[%s4553_s5 + $0xd0] sm:$0xff]  ;;  %v2422_v43 = vld [vmem:[%s4553_s5 + $0xd8] sm:$0xff] }
 0x50b   : > { %3229 = vpow2.f32 %v2613_v48  ;;  %2945 = vmatpush3.bf16.msra.mxu0 %v4150_v56  ;;  %v2992_v48 = vpack.c.bf16 %v2404_v0, %v2403_v9 }
 0x50c   : > { %2947 = vmatprep.subr.bf16.mxu0 %v4157_v16 }
 0x50f   : > { %2949 = vmatpush3.bf16.msra.mxu0 %v4157_v16 }
 0x510   : > { %2951 = vmatprep.subr.bf16.mxu0 %v4168_v17 }
 0x513   : > { %2953 = vmatpush3.bf16.msra.mxu0 %v4168_v17 }
 0x514   : > { %v3228_v10 = vpop.eup %3227  ;;  %2955 = vmatprep.subr.bf16.mxu0 %v4176_v19 }
 0x515   : > { %v3230_v47 = vpop.eup %3229  ;;  %v2183_v21 = vadd.f32 1.0, %v3228_v10  ;;  %v2994_v10 = vpack.c.bf16 %v2422_v43, %v2421_v42 }
 0x516   : > { %v2182_v61 = vadd.f32 1.0, %v3230_v47  ;;  %v2405_v47 = vld [vmem:[%s4553_s5 + $0x50] sm:$0xff] }
 0x517   : > { %3231 = vrcp.f32 %v2183_v21  ;;  %2957 = vmatpush3.bf16.msra.mxu0 %v4176_v19  ;;  %v2406_v21 = vld [vmem:[%s4553_s5 + $0x58] sm:$0xff] }
 0x518   : > { %3233 = vrcp.f32 %v2182_v61  ;;  %v2423_v61 = vld [vmem:[%s4553_s5 + $0xe0] sm:$0xff] }
 0x521   : > { %v3232_v50 = vpop.eup %3231 }
 0x522   : > { %v3234_v56 = vpop.eup %3233  ;;  %v2191_v63 = vsub.f32 1.0, %v3232_v50  ;;  %v2189_v17 = vmul.f32 %v3232_v50, %v4242_v29  ;;  %v2424_v50 = vld [vmem:[%s4553_s5 + $0xe8] sm:$0xff] }
 0x523   : > { %v2190_v51 = vsub.f32 1.0, %v3234_v56  ;;  %v2188_v16 = vmul.f32 %v3234_v56, %v4224_v26  ;;  %v2996_v56 = vpack.c.bf16 %v2406_v21, %v2405_v47 }
 0x524   : > { %v2195_v34 = vmul.f32 %v2191_v63, %v2096_v39  ;;  %v2415_v39 = vld [vmem:[%s4553_s5 + $0xa0] sm:$0xff]  ;;  %v2998_v63 = vpack.c.bf16 %v2424_v50, %v2423_v61 }
 0x525   : > { %v2194_v57 = vmul.f32 %v2190_v51, %v4385_v14  ;;  %v2982_v33 = vpack.c.bf16 %v2416_v38, %v2415_v39  ;;  %v2407_v51 = vld [vmem:[%s4553_s5 + $0x60] sm:$0xff] }
 0x526   : > { %v4422_v45 = vadd.f32 %v2195_v34, %v2189_v17  ;;  %v2408_v34 = vld [vmem:[%s4553_s5 + $0x68] sm:$0xff] }
 0x527   : > { %v4420_v5 = vadd.f32 %v2194_v57, %v2188_v16  ;;  %v3000_v16 = vpack.c.bf16 %v2408_v34, %v2407_v51  ;;  %v1220_v57 = vpop.permute.xlu0 %1219 }
 0x529   : > { %2856 = vmatprep.mubr.msk.f32.mxu0 %vm769_vm5, %v4420_v5 }
 0x52a   : > { %2857 = vmatmul.mubr.msk.f32.vlgmr.msra.gmra.mrb[8].mxu0 %vm769_vm5, %v4422_v45 }
 0x5dd   : > { %v4428_v19 = vpop.f32.mrb[6].mxu0 }
 0x5de   : > { %v2820_v44 = vpop.f32.mrb[7].mxu0  ;;  %v1292_v17 = vadd.f32 %v4428_v19, %v1220_v57 }
 0x5e0   : > { %v1295_v44 = vmul.f32 %v1292_v17, %v4378_v13 }
 0x5fd   : > { %v2858_v2 = vpop.f32.mrb[8].mxu0 }
 0x5fe   : > { %v2276_v26 = vadd.f32 %v2858_v2, %v4316_v52  ;;  %v2270_v24 = vpop.f32.mrb[9].mxu0  ;;  %v1296_v2 = vsel %vm769_vm5, %v1295_v44, 0.0 }
 0x5ff   : > { %v2271_v12 = vadd.f32 %v2270_v24, %v4316_v52  ;;  %v2411_v52 = vld [vmem:[%s4553_s5 + $0x80] sm:$0xff] }
 0x600   : > { %v2282_v29 = vmin.f32 %v2276_v26, 0.0  ;;  %vm2280_vm0 = vcmp.gt.f32.partialorder %v2276_v26, 0.0  ;;  %v2974_v58 = vpack.c.bf16 %v2412_v11, %v2411_v52  ;;  %v2425_v52 = vld [vmem:[%s4553_s5 + $0xf0] sm:$0xff]  ;;  %v2426_v11 = vld [vmem:[%s4553_s5 + $0xf8] sm:$0xff] }
 0x601   : > { %v2281_v30 = vmin.f32 %v2271_v12, 0.0  ;;  %vm2279_vm15 = vcmp.gt.f32.partialorder %v2271_v12, 0.0  ;;  %v3002_v20 = vpack.c.bf16 %v2426_v11, %v2425_v52 }
 0x602   : > { %v2285_v60 = vmul.f32 1.442695, %v2282_v29  ;;  %2975 = vmatprep.subr.bf16.mxu0 %v2974_v58  ;;  %v2410_v58 = vld [vmem:[%s4553_s5 + $0x78] sm:$0xff] }
 0x603   : > { %v2283_v4 = vmul.f32 1.442695, %v2281_v30  ;;  %2977 = vmatpush3.bf16.msra.mxu0 %v2976_v35 }
 0x604   : > { %3235 = vpow2.f32 %v2285_v60  ;;  %2979 = vmatprep.subr.bf16.mxu0 %v2978_v37 }
 0x605   : > { %3237 = vpow2.f32 %v2283_v4 }
 0x607   : > { %2981 = vmatpush3.bf16.msra.mxu0 %v2980_v7 }
 0x608   : > { %2983 = vmatprep.subr.bf16.mxu0 %v2982_v33 }
 0x60b   : > { %2985 = vmatpush3.bf16.msra.mxu0 %v2984_v36 }
 0x60c   : > { %2987 = vmatprep.subr.bf16.mxu0 %v2986_v3  ;;  %v2428_v3 = vpop.permute.xlu0 %2427 }
 0x60e   : > { %v3236_v46 = vpop.eup %3235 }
 0x60f   : > { %v3238_v23 = vpop.eup %3237  ;;  %v2618_v41 = vadd.f32 -1.0, %v3236_v46  ;;  %2989 = vmatpush3.bf16.msra.mxu0 %v2988_v15 }
 0x610   : > { %v2617_v31 = vadd.f32 -1.0, %v3238_v23  ;;  %2991 = vmatprep.subr.bf16.mxu0 %v2990_v49  ;;  %v3256_v49 = vmov 0   ;;  %v2508_v9 = vpop.permute.xlu0 %2507 }
 0x611   : > { %v2290_v14 = vsel %vm2280_vm0, %v2276_v26, %v2618_v41  ;;  %v1297_v26 = vrot.slane %v1296_v2, 4  ;;  %3064 = vset.pattern.permute.xlu0 %v3256_v49 }
 0x612   : > { %v2289_v22 = vsel %vm2279_vm15, %v2271_v12, %v2617_v31 }
 0x613   : > { %2875 = vmatprep.mubr.msk.f32.mxu1 %vm769_vm5, %v2289_v22  ;;  %2993 = vmatpush3.bf16.msra.mxu0 %v2992_v48  ;;  %v1298_v60 = vadd.f32 %v1297_v26, %v1296_v2 }
 0x614   : > { %2876 = vmatmul.mubr.msk.f32.vlgmr.msra.gmra.mrb[12].mxu1 %vm769_vm5, %v2290_v14  ;;  %2995 = vmatprep.subr.bf16.mxu0 %v2994_v10 }
 0x615   : > { %v1299_v31 = vrot.slane %v1298_v60, 2 }
 0x617   : > { %2997 = vmatpush3.bf16.msra.mxu0 %v2996_v56  ;;  %v1300_v13 = vadd.f32 %v1299_v31, %v1298_v60 }
 0x618   : > { %2999 = vmatprep.subr.bf16.mxu0 %v2998_v63 }
 0x619   : > { %v1301_v55 = vrot.slane %v1300_v13, 1 }
 0x61b   : > { %3001 = vmatpush3.bf16.msra.mxu0 %v3000_v16  ;;  %v1302_v37 = vadd.f32 %v1301_v55, %v1300_v13 }
 0x61c   : > { %3003 = vmatprep.subr.bf16.mxu0 %v3002_v20 }
 0x6e7   : > { %v2877_v24 = vpop.f32.mrb[12].mxu1 }
 0x6e8   : > { %v2369_v12 = vadd.f32 %v2877_v24, %v1220_v57  ;;  %v2363_v29 = vpop.f32.mrb[13].mxu1 }
 0x6e9   : > { %v2364_v30 = vadd.f32 %v2363_v29, %v1220_v57 }
 0x6ea   : > { %v2373_v4 = vmul.f32 %v2369_v12, %v4422_v45 }
 0x6eb   : > { %v2372_v46 = vmul.f32 %v2364_v30, %v4420_v5  ;;  %v2409_v5 = vld [vmem:[%s4553_s5 + $0x70] sm:$0xff] }
 0x6ec   : > { %v2375_v23 = vsel %vm1675_vm13, %v2373_v4, 0.0  ;;  %v3004_v18 = vpack.c.bf16 %v2410_v58, %v2409_v5 }
 0x6ed   : > { %v2374_v41 = vsel %vm769_vm5, %v2372_v46, 0.0 }
 0x6ee   : > { %v2376_v19 = vadd.f32 %v2375_v23, %v2374_v41  ;;  %3005 = vmatpush3.bf16.msra.mxu0 %v3004_v18 }
 0x6f0   : > { %v2377_v22 = vrot.slane %v2376_v19, 4 }
 0x6f2   : > { %v2378_v14 = vadd.f32 %v2377_v22, %v2376_v19 }
 0x6f4   : > { %v2379_v45 = vrot.slane %v2378_v14, 2 }
 0x6f6   : > { %v2380_v28 = vadd.f32 %v2379_v45, %v2378_v14 }
 0x6f8   : > { %v2381_v35 = vrot.slane %v2380_v28, 1 }
 0x6fa   : > { %v2382_v53 = vadd.f32 %v2381_v35, %v2380_v28 }
 0x6fc   : > { %v2384_v1 = vmul.f32 %v2382_v53, %v1302_v37  ;;  %v2383_v27 = vsub.f32 %v1302_v37, %v2382_v53 }
 0x6fe   : > { %v3059_v39 = vpack.i.bf16 %v2382_v53, %v2384_v1 }
 0x700   : > { %3060 = vrot.lane.b32.xlu1 %v3059_v39, %s3253_s19 }
 0x772   : > { %v3061_v38 = vpop.permute.xlu1 %3060 }
 0x773   : > { %v3063_v7 = vunpack.i.h.bf16 %v3061_v38  ;;  %v3062_v33 = vunpack.i.l.bf16 %v3061_v38 }
 0x775   : > { %v2394_v32 = vsel %vm769_vm5, %v2383_v27, %v3062_v33  ;;  %v2393_v6 = vsel %vm769_vm5, %v1302_v37, %v3063_v7 }
 0x776   : > { %2494 = vmatprep.mubr.f32.mxu0 %v2394_v32 }
 0x777   : > { %2495 = vmatmul.mubr.f32.vlgmr.msra.gmra.mrb[10].mxu0 %v2393_v6 }
 0x84a   : > { %v2727_v54 = vpop.f32.mrb[10].mxu0 }
 0x84b   : > { %v2728_v36 = vpop.f32.mrb[11].mxu0 }
 0x84c   : > { %v2729_v40 = vadd.f32 %v2728_v36, %v2727_v54 }
 0x84e   : > { %v2497_v25 = vadd.f32 %v2729_v40, %v2428_v3 }
 0x850   : > { %v2500_v8 = vmax.f32 %v2497_v25, 0.0 }
 0x852   : > { %v2502_v59 = vmul.f32 %v2500_v8, %v4593_v62 }
 0x854   : > { %v2504_v15 = vsel %vm2503_vm1, %v2502_v59, 0.0 }
 0x855   : > { %2505 = vadd.xlane.f32.xlu1 %v2504_v15 }
 0x8e2   : > { %v2506_v0 = vpop.xlane.xlu1 %2505 }
 0x8e3   : > { %v2510_v42 = vadd.f32 %v2508_v9, %v2506_v0 }
 0x8e5   : > { %2513 = vperm.xlu0 %3064, %v2510_v42  }
 0x964   : > { %v2514_v43 = vpop.permute.xlu0 %2513 }
 0x965   : > { %2516 = vst [vmem:[%s314_s12] sm:$0x1] %v2514_v43 }
 0x966 PF: > { %s17_s24 = sadd.s32 1, %s3246_s24  }
 0x967   : > { %p14_p4 = scmp.ge.s32.totalorder %s17_s24, 4  }
 0x969   :  { %16 = sbr.rel (!%p14_p4) target bundleno = 1 (0x1), region = 84 }

</bundles_post_ra>
